<compile_context>
chip_gen: v7x
topology: tpu7x:2x2x1
jax: 0.10.0
libtpu: 0.0.40
codegen_flags: <defaults>
</compile_context>

<pallas_src>
import functools
import math

import jax
import jax.numpy as jnp
from jax.experimental import pallas as pl
from jax.experimental.pallas import tpu as pltpu


COMPUTE_DTYPE = jnp.bfloat16   # matmul operand dtype (f32 accumulation everywhere)
LN_EPS = 1e-5                  # matches torch.nn.LayerNorm default
NEG_INF = -1e9


# ------------------------------ Pallas kernel -------------------------------

def _layer_norm(y, gamma, beta, eps=LN_EPS):
    mean = jnp.mean(y, axis=-1, keepdims=True)
    var = jnp.mean((y - mean) ** 2, axis=-1, keepdims=True)
    return (y - mean) * jax.lax.rsqrt(var + eps) * gamma + beta


def encoder_layer_kernel(lens_ref,                      # scalar prefetch: (B,) int32 (SMEM)
                         xkv_ref,                       # (1, T, D) full-sequence block (bf16)
                         wq_ref, bq_ref, wk_ref, bk_ref, wv_ref, bv_ref,
                         wo_ref, bo_ref, g1_ref, be1_ref,
                         w1_ref, b1_ref, w2_ref, b2_ref, g2_ref, be2_ref,
                         out_ref,
                         k_scr, v_scr,                  # VMEM scratch: (H, T, d_k)/(H, T, d_v) bf16
                         *, n_head, d_k, d_v, tq):
    """Fused encoder layer for one (batch element, query tile) grid point:

        y1 = LayerNorm(MHA(xq; x_full, key_pad_mask) + xq) * non_pad_mask
        y2 = LayerNorm(FFN(y1) + y1) * non_pad_mask
    """
    b = pl.program_id(0)
    qi = pl.program_id(1)
    length = lens_ref[b]
    T = xkv_ref.shape[1]

    # --- K/V projections computed ONCE per batch element (qi axis is "arbitrary") ---
    @pl.when(qi == 0)
    def _():
        xkv = xkv_ref[0]                                              # (T, D) bf16
        k = jnp.dot(xkv, wk_ref[...], preferred_element_type=jnp.float32) + bk_ref[...]
        v = jnp.dot(xkv, wv_ref[...], preferred_element_type=jnp.float32) + bv_ref[...]
        k_scr[...] = k.astype(COMPUTE_DTYPE).reshape(T, n_head, d_k).transpose(1, 0, 2)
        v_scr[...] = v.astype(COMPUTE_DTYPE).reshape(T, n_head, d_v).transpose(1, 0, 2)

    # --- query tile sliced from the already-resident full-sequence block ---
    qstart = pl.multiple_of(qi * tq, tq)
    xq_c = xkv_ref[0, pl.ds(qstart, tq), :]                           # (TQ, D) bf16
    xq = xq_c.astype(jnp.float32)                                     # f32 residual

    q = jnp.dot(xq_c, wq_ref[...], preferred_element_type=jnp.float32) + bq_ref[...]
    q = q * (1.0 / math.sqrt(d_k))                                    # scale folded into q once
    qh = q.astype(COMPUTE_DTYPE).reshape(tq, n_head, d_k).transpose(1, 0, 2)   # (H, TQ, d_k)

    # --- batched-over-heads attention (single dot_general pair, full MXU fill) ---
    s = jnp.einsum('hqd,hkd->hqk', qh, k_scr[...],
                   preferred_element_type=jnp.float32)                # (H, TQ, T) f32
    key_pad = jax.lax.broadcasted_iota(jnp.int32, (1, 1, T), 2) >= length
    s = jnp.where(key_pad, NEG_INF, s)
    s = s - jnp.max(s, axis=-1, keepdims=True)
    p = jnp.exp(s)                                                    # f32 softmax
    p = p * pl.reciprocal(jnp.sum(p, axis=-1, keepdims=True), approx=True)
    ctx = jnp.einsum('hqk,hkd->hqd', p.astype(COMPUTE_DTYPE), v_scr[...],
                     preferred_element_type=jnp.float32)              # (H, TQ, d_v)
    ctx = ctx.transpose(1, 0, 2).reshape(tq, n_head * d_v)            # (TQ, H*d_v)

    # single output projection with the full n_head*d_v contraction
    o = jnp.dot(ctx.astype(COMPUTE_DTYPE), wo_ref[...],
                preferred_element_type=jnp.float32) + bo_ref[...]

    q_pos = qstart + jax.lax.broadcasted_iota(jnp.int32, (tq, 1), 0)
    npm = (q_pos < length).astype(jnp.float32)                        # (TQ, 1) non-pad mask

    y1 = _layer_norm(o + xq, g1_ref[...], be1_ref[...]) * npm

    # position-wise FFN; residual is the masked y1 (matches reference module)
    h1 = jnp.dot(y1.astype(COMPUTE_DTYPE), w1_ref[...],
                 preferred_element_type=jnp.float32) + b1_ref[...]
    h1 = jnp.maximum(h1, 0.0)
    o2 = jnp.dot(h1.astype(COMPUTE_DTYPE), w2_ref[...],
                 preferred_element_type=jnp.float32) + b2_ref[...]
    y2 = _layer_norm(o2 + y1, g2_ref[...], be2_ref[...]) * npm

    out_ref[0] = y2.astype(out_ref.dtype)


# ---------------------------- pallas_call wrapper ----------------------------

_WEIGHT_NAMES = ["wq", "bq", "wk", "bk", "wv", "bv", "wo", "bo",
                 "ln1_g", "ln1_b", "w1", "b1", "w2", "b2", "ln2_g", "ln2_b"]


def encoder_layer(x, input_lengths, p, *, n_head, d_k, d_v, tq=None,
                  vmem_cap_bytes=56 * 1024 * 1024):
    """One fused encoder layer over the whole batch: grid = (B, T // TQ)."""
    B, T, D = x.shape
    if tq is None:
        tq = min(T, 256)        # v6e sweet spot; v5e is happy at 128-256 as well
    assert T % tq == 0, "query tile must divide T"
    assert tq % 8 == 0 or tq == T, "query tile must be sublane-aligned"
    n_q = T // tq

    weights = [p[n] for n in _WEIGHT_NAMES]
    # Whole-array VMEM operands: resident once for the whole grid (no 2x
    # double-buffer reservation) -> fits v7x's 64 MiB VMEM for large d_model.
    weight_spec = pl.BlockSpec(memory_space=pltpu.MemorySpace.VMEM)

    # Explicit VMEM budget from actual buffers (+ generous headroom), capped for v7x.
    bpe = 2  # bf16
    w_bytes = sum(int(a.size) * a.dtype.itemsize for a in weights)
    est = (w_bytes                                    # weights (single copy)
           + 2 * T * D * bpe                          # double-buffered (1,T,D) input block
           + 2 * tq * D * bpe                         # double-buffered output tile
           + n_head * T * (d_k + d_v) * bpe           # K/V scratch
           + 4 * n_head * tq * T * 4                  # score/softmax f32 temporaries
           + 8 * tq * max(D, p["w1"].shape[1]) * 4)   # misc f32 activation temporaries
    vmem_limit = int(min(max(2 * est, 32 * 1024 * 1024), vmem_cap_bytes))

    kernel = functools.partial(encoder_layer_kernel,
                               n_head=n_head, d_k=d_k, d_v=d_v, tq=tq)

    return pl.pallas_call(
        kernel,
        out_shape=jax.ShapeDtypeStruct((B, T, D), x.dtype),
        grid_spec=pltpu.PrefetchScalarGridSpec(
            num_scalar_prefetch=1,
            grid=(B, n_q),
            in_specs=[pl.BlockSpec((1, T, D), lambda b, qi, lens: (b, 0, 0))]
                     + [weight_spec] * len(weights),
            out_specs=pl.BlockSpec((1, tq, D), lambda b, qi, lens: (b, qi, 0)),
            scratch_shapes=[pltpu.VMEM((n_head, T, d_k), COMPUTE_DTYPE),
                            pltpu.VMEM((n_head, T, d_v), COMPUTE_DTYPE)],
        ),
        compiler_params=pltpu.CompilerParams(
            # qi MUST be "arbitrary": K/V scratch is written at qi==0 and reused
            # across the remaining query tiles of the same batch element.
            dimension_semantics=("parallel", "arbitrary"),
            vmem_limit_bytes=vmem_limit),
    )(input_lengths, x, *weights)


# ------------------------------ glue (plain JAX) -----------------------------

def positional_encoding(max_len, d_model):
    pos = jnp.arange(max_len, dtype=jnp.float32)[:, None]
    i = jnp.arange(0, d_model, 2, dtype=jnp.float32)
    div = jnp.exp(-(math.log(10000.0)) * i / d_model)
    pe = jnp.zeros((max_len, d_model), jnp.float32)
    pe = pe.at[:, 0::2].set(jnp.sin(pos * div))
    pe = pe.at[:, 1::2].set(jnp.cos(pos * div))
    return pe


def init_encoder_params(key, *, n_src_vocab, n_layers, n_head, d_k, d_v,
                        d_model, d_inner, pe_maxlen, pad_id):
    k_emb, k_layers = jax.random.split(key)
    emb = 0.02 * jax.random.normal(k_emb, (n_src_vocab, d_model), jnp.float32)
    emb = emb.at[pad_id].set(0.0)          # nn.Embedding(padding_idx=pad_id)

    def w(k, shape):   # matmul weights stored bf16 (MXU operands); biases/LN stay f32
        return (0.05 * jax.random.normal(k, shape, jnp.float32)).astype(COMPUTE_DTYPE)

    layers = []
    for li in range(n_layers):
        ks = jax.random.split(jax.random.fold_in(k_layers, li), 6)
        layers.append(dict(
            wq=w(ks[0], (d_model, n_head * d_k)),
            bq=jnp.zeros((1, n_head * d_k), jnp.float32),
            wk=w(ks[1], (d_model, n_head * d_k)),
            bk=jnp.zeros((1, n_head * d_k), jnp.float32),
            wv=w(ks[2], (d_model, n_head * d_v)),
            bv=jnp.zeros((1, n_head * d_v), jnp.float32),
            wo=w(ks[3], (n_head * d_v, d_model)),
            bo=jnp.zeros((1, d_model), jnp.float32),
            ln1_g=jnp.ones((1, d_model), jnp.float32),
            ln1_b=jnp.zeros((1, d_model), jnp.float32),
            w1=w(ks[4], (d_model, d_inner)),
            b1=jnp.zeros((1, d_inner), jnp.float32),
            w2=w(ks[5], (d_inner, d_model)),
            b2=jnp.zeros((1, d_model), jnp.float32),
            ln2_g=jnp.ones((1, d_model), jnp.float32),
            ln2_b=jnp.zeros((1, d_model), jnp.float32),
        ))
    return dict(emb=emb, pe=positional_encoding(pe_maxlen, d_model), layers=layers)


def encoder_forward(params, padded_input, input_lengths, *, n_head, d_k, d_v, tq=None):
    """Equivalent of Encoder.forward(padded_input, input_lengths) -> (enc_output,)"""
    B, T = padded_input.shape
    x = params["emb"][padded_input] + params["pe"][:T][None, :, :]   # embed + PE (f32)
    # dropout: identity (eval mode)
    x = x.astype(COMPUTE_DTYPE)   # bf16 inter-layer activations: halves HBM traffic & VMEM
    lengths = input_lengths.astype(jnp.int32)
    for lp in params["layers"]:
        # TODO(synk): hide per-layer weight DMA via cross-pallas_call prefetch (P10)
        # and add flash-style KV tiling (online softmax) for T >~ 2k on v7x.
        x = encoder_layer(x, lengths, lp, n_head=n_head, d_k=d_k, d_v=d_v, tq=tq)
    return (x,)


# ------------------------------------ main -----------------------------------

if __name__ == "__main__":
    # small, module-consistent shapes; 2 query tiles per sequence so the
    # cached-K/V (qi==0) path is actually exercised.
    B, T = 2, 32
    n_src_vocab = 50
    n_layers = 2
    n_head = 4
    d_k = d_v = 32
    d_model = 128
    d_inner = 256
    pe_maxlen = 64
    pad_id = 0
    TQ = 16

    key = jax.random.PRNGKey(0)
    k_par, k_tok = jax.random.split(key)

    params = init_encoder_params(
        k_par, n_src_vocab=n_src_vocab, n_layers=n_layers, n_head=n_head,
        d_k=d_k, d_v=d_v, d_model=d_model, d_inner=d_inner,
        pe_maxlen=pe_maxlen, pad_id=pad_id)

    input_lengths = jnp.array([32, 23], dtype=jnp.int32)
    tokens = jax.random.randint(k_tok, (B, T), 1, n_src_vocab, dtype=jnp.int32)
    pos = jnp.arange(T)[None, :]
    padded_input = jnp.where(pos < input_lengths[:, None], tokens, pad_id)

    (enc_output,) = encoder_forward(params, padded_input, input_lengths,
                                    n_head=n_head, d_k=d_k, d_v=d_v, tq=TQ)
    enc_output = jax.block_until_ready(enc_output)

    assert enc_output.shape == (B, T, d_model)
    assert bool(jnp.all(jnp.isfinite(enc_output.astype(jnp.float32))))
    print("KERNEL_OK")
</pallas_src>

<mosaic_0001>
module attributes {stable_mosaic.version = 11 : i64} {
  func.func @encoder_layer_kernel(%arg0: i32, %arg1: i32, %arg2: memref<2xi32, #tpu.memory_space<smem>>, %arg3: memref<1x32x128xbf16, #tpu.memory_space<vmem>>, %arg4: memref<128x128xbf16, #tpu.memory_space<vmem>>, %arg5: memref<1x128xf32, #tpu.memory_space<vmem>>, %arg6: memref<128x128xbf16, #tpu.memory_space<vmem>>, %arg7: memref<1x128xf32, #tpu.memory_space<vmem>>, %arg8: memref<128x128xbf16, #tpu.memory_space<vmem>>, %arg9: memref<1x128xf32, #tpu.memory_space<vmem>>, %arg10: memref<128x128xbf16, #tpu.memory_space<vmem>>, %arg11: memref<1x128xf32, #tpu.memory_space<vmem>>, %arg12: memref<1x128xf32, #tpu.memory_space<vmem>>, %arg13: memref<1x128xf32, #tpu.memory_space<vmem>>, %arg14: memref<128x256xbf16, #tpu.memory_space<vmem>>, %arg15: memref<1x256xf32, #tpu.memory_space<vmem>>, %arg16: memref<256x128xbf16, #tpu.memory_space<vmem>>, %arg17: memref<1x128xf32, #tpu.memory_space<vmem>>, %arg18: memref<1x128xf32, #tpu.memory_space<vmem>>, %arg19: memref<1x128xf32, #tpu.memory_space<vmem>>, %arg20: memref<1x16x128xbf16, #tpu.memory_space<vmem>>, %arg21: memref<4x32x32xbf16, #tpu.memory_space<vmem>>, %arg22: memref<4x32x32xbf16, #tpu.memory_space<vmem>>) attributes {dimension_semantics = [#tpu.dimension_semantics<parallel>, #tpu.dimension_semantics<arbitrary>], iteration_bounds = array<i64: 2, 2>, scalar_prefetch = 1 : i64, scratch_operands = 2 : i64, tpu.core_type = #tpu.core_type<tc>, window_params = [{transform_indices = @transform_0, window_bounds = array<i64: 1, 32, 128>}, {pipeline_mode = #tpu.pipeline_mode<synchronous>, transform_indices = @transform_1, window_bounds = array<i64: 128, 128>}, {pipeline_mode = #tpu.pipeline_mode<synchronous>, transform_indices = @transform_2, window_bounds = array<i64: 1, 128>}, {pipeline_mode = #tpu.pipeline_mode<synchronous>, transform_indices = @transform_3, window_bounds = array<i64: 128, 128>}, {pipeline_mode = #tpu.pipeline_mode<synchronous>, transform_indices = @transform_4, window_bounds = array<i64: 1, 128>}, {pipeline_mode = #tpu.pipeline_mode<synchronous>, transform_indices = @transform_5, window_bounds = array<i64: 128, 128>}, {pipeline_mode = #tpu.pipeline_mode<synchronous>, transform_indices = @transform_6, window_bounds = array<i64: 1, 128>}, {pipeline_mode = #tpu.pipeline_mode<synchronous>, transform_indices = @transform_7, window_bounds = array<i64: 128, 128>}, {pipeline_mode = #tpu.pipeline_mode<synchronous>, transform_indices = @transform_8, window_bounds = array<i64: 1, 128>}, {pipeline_mode = #tpu.pipeline_mode<synchronous>, transform_indices = @transform_9, window_bounds = array<i64: 1, 128>}, {pipeline_mode = #tpu.pipeline_mode<synchronous>, transform_indices = @transform_10, window_bounds = array<i64: 1, 128>}, {pipeline_mode = #tpu.pipeline_mode<synchronous>, transform_indices = @transform_11, window_bounds = array<i64: 128, 256>}, {pipeline_mode = #tpu.pipeline_mode<synchronous>, transform_indices = @transform_12, window_bounds = array<i64: 1, 256>}, {pipeline_mode = #tpu.pipeline_mode<synchronous>, transform_indices = @transform_13, window_bounds = array<i64: 256, 128>}, {pipeline_mode = #tpu.pipeline_mode<synchronous>, transform_indices = @transform_14, window_bounds = array<i64: 1, 128>}, {pipeline_mode = #tpu.pipeline_mode<synchronous>, transform_indices = @transform_15, window_bounds = array<i64: 1, 128>}, {pipeline_mode = #tpu.pipeline_mode<synchronous>, transform_indices = @transform_16, window_bounds = array<i64: 1, 128>}, {transform_indices = @transform_17, window_bounds = array<i64: 1, 16, 128>}]} {
    %0 = arith.index_cast %arg0 : i32 to index
    %1 = memref.load %arg2[%0] : memref<2xi32, #tpu.memory_space<smem>>
    %c0_i32 = arith.constant 0 : i32
    %2 = arith.cmpi eq, %arg1, %c0_i32 : i32
    %3 = arith.extui %2 : i1 to i32
    %c0_i32_0 = arith.constant 0 : i32
    %4 = arith.cmpi ne, %3, %c0_i32_0 : i32
    scf.if %4 {
      %c0_55 = arith.constant 0 : index
      %c0_56 = arith.constant 0 : index
      %c0_57 = arith.constant 0 : index
      %130 = vector.load %arg3[%c0_55, %c0_56, %c0_57] : memref<1x32x128xbf16, #tpu.memory_space<vmem>>, vector<1x32x128xbf16>
      %131 = vector.shape_cast %130 : vector<1x32x128xbf16> to vector<32x128xbf16>
      %c0_58 = arith.constant 0 : index
      %c0_59 = arith.constant 0 : index
      %132 = vector.load %arg6[%c0_58, %c0_59] : memref<128x128xbf16, #tpu.memory_space<vmem>>, vector<128x128xbf16>
      %cst_60 = arith.constant dense<0.000000e+00> : vector<32x128xf32>
      %133 = tpu.matmul %131, %132, %cst_60 {dimension_numbers = #tpu.dot_dimension_numbers<[1], [0], [0], [1], [0, 0, 1, 1], [], []>} : vector<32x128xbf16>, vector<128x128xbf16>, vector<32x128xf32> -> vector<32x128xf32>
      %c0_61 = arith.constant 0 : index
      %c0_62 = arith.constant 0 : index
      %134 = vector.load %arg7[%c0_61, %c0_62] : memref<1x128xf32, #tpu.memory_space<vmem>>, vector<1x128xf32>
      %135 = vector.broadcast %134 : vector<1x128xf32> to vector<32x128xf32>
      %136 = arith.addf %133, %135 : vector<32x128xf32>
      %c0_63 = arith.constant 0 : index
      %c0_64 = arith.constant 0 : index
      %137 = vector.load %arg8[%c0_63, %c0_64] : memref<128x128xbf16, #tpu.memory_space<vmem>>, vector<128x128xbf16>
      %cst_65 = arith.constant dense<0.000000e+00> : vector<32x128xf32>
      %138 = tpu.matmul %131, %137, %cst_65 {dimension_numbers = #tpu.dot_dimension_numbers<[1], [0], [0], [1], [0, 0, 1, 1], [], []>} : vector<32x128xbf16>, vector<128x128xbf16>, vector<32x128xf32> -> vector<32x128xf32>
      %c0_66 = arith.constant 0 : index
      %c0_67 = arith.constant 0 : index
      %139 = vector.load %arg9[%c0_66, %c0_67] : memref<1x128xf32, #tpu.memory_space<vmem>>, vector<1x128xf32>
      %140 = vector.broadcast %139 : vector<1x128xf32> to vector<32x128xf32>
      %141 = arith.addf %138, %140 : vector<32x128xf32>
      %142 = arith.truncf %136 : vector<32x128xf32> to vector<32x128xbf16>
      %143 = vector.shape_cast %142 : vector<32x128xbf16> to vector<32x4x32xbf16>
      %144 = tpu.transpose %143, [1, 0, 2] : vector<32x4x32xbf16> -> vector<4x32x32xbf16>
      %c0_68 = arith.constant 0 : index
      %c0_69 = arith.constant 0 : index
      %c0_70 = arith.constant 0 : index
      %145 = vector.load %arg21[%c0_68, %c0_69, %c0_70] : memref<4x32x32xbf16, #tpu.memory_space<vmem>>, vector<4x32x32xbf16>
      tpu.vector_store %arg21[%c0_68, %c0_69, %c0_70], %144 {strides = array<i32>} : memref<4x32x32xbf16, #tpu.memory_space<vmem>>, vector<4x32x32xbf16>,
      %146 = arith.truncf %141 : vector<32x128xf32> to vector<32x128xbf16>
      %147 = vector.shape_cast %146 : vector<32x128xbf16> to vector<32x4x32xbf16>
      %148 = tpu.transpose %147, [1, 0, 2] : vector<32x4x32xbf16> -> vector<4x32x32xbf16>
      %c0_71 = arith.constant 0 : index
      %c0_72 = arith.constant 0 : index
      %c0_73 = arith.constant 0 : index
      %149 = vector.load %arg22[%c0_71, %c0_72, %c0_73] : memref<4x32x32xbf16, #tpu.memory_space<vmem>>, vector<4x32x32xbf16>
      tpu.vector_store %arg22[%c0_71, %c0_72, %c0_73], %148 {strides = array<i32>} : memref<4x32x32xbf16, #tpu.memory_space<vmem>>, vector<4x32x32xbf16>,
    } else {
    }
    %c16_i32 = arith.constant 16 : i32
    %5 = arith.muli %arg1, %c16_i32 : i32
    %6 = tpu.assume_multiple %5, 16 : i32
    %c0 = arith.constant 0 : index
    %7 = arith.index_cast %6 : i32 to index
    %c0_1 = arith.constant 0 : index
    %8 = vector.load %arg3[%c0, %7, %c0_1] : memref<1x32x128xbf16, #tpu.memory_space<vmem>>, vector<1x16x128xbf16>
    %9 = vector.shape_cast %8 : vector<1x16x128xbf16> to vector<16x128xbf16>
    %10 = arith.extf %9 : vector<16x128xbf16> to vector<16x128xf32>
    %c0_2 = arith.constant 0 : index
    %c0_3 = arith.constant 0 : index
    %11 = vector.load %arg4[%c0_2, %c0_3] : memref<128x128xbf16, #tpu.memory_space<vmem>>, vector<128x128xbf16>
    %cst = arith.constant dense<0.000000e+00> : vector<16x128xf32>
    %12 = tpu.matmul %9, %11, %cst {dimension_numbers = #tpu.dot_dimension_numbers<[1], [0], [0], [1], [0, 0, 1, 1], [], []>} : vector<16x128xbf16>, vector<128x128xbf16>, vector<16x128xf32> -> vector<16x128xf32>
    %c0_4 = arith.constant 0 : index
    %c0_5 = arith.constant 0 : index
    %13 = vector.load %arg5[%c0_4, %c0_5] : memref<1x128xf32, #tpu.memory_space<vmem>>, vector<1x128xf32>
    %14 = vector.broadcast %13 : vector<1x128xf32> to vector<16x128xf32>
    %15 = arith.addf %12, %14 : vector<16x128xf32>
    %cst_6 = arith.constant 0.176776692 : f32
    %16 = vector.broadcast %cst_6 : f32 to vector<16x128xf32>
    %17 = arith.mulf %15, %16 : vector<16x128xf32>
    %18 = arith.truncf %17 : vector<16x128xf32> to vector<16x128xbf16>
    %19 = vector.shape_cast %18 : vector<16x128xbf16> to vector<16x4x32xbf16>
    %20 = tpu.transpose %19, [1, 0, 2] : vector<16x4x32xbf16> -> vector<4x16x32xbf16>
    %c0_7 = arith.constant 0 : index
    %c0_8 = arith.constant 0 : index
    %c0_9 = arith.constant 0 : index
    %21 = vector.load %arg21[%c0_7, %c0_8, %c0_9] : memref<4x32x32xbf16, #tpu.memory_space<vmem>>, vector<4x32x32xbf16>
    "tpu.trace_start"() <{level = 10 : i32, message = "hqd,hkd->hqk"}> : () -> ()
    %cst_10 = arith.constant dense<0.000000e+00> : vector<4x16x32xf32>
    %22 = tpu.matmul %20, %21, %cst_10 {dimension_numbers = #tpu.dot_dimension_numbers<[2], [2], [1], [1], [0, 0, 0, 1, 1, 1], [0], [0]>} : vector<4x16x32xbf16>, vector<4x32x32xbf16>, vector<4x16x32xf32> -> vector<4x16x32xf32>
    "tpu.trace_stop"() : () -> ()
    %23 = tpu.iota {dimensions = array<i32: 2>} : vector<1x1x32xi32>
    %24 = vector.broadcast %1 : i32 to vector<1x1x32xi32>
    %25 = arith.cmpi sge, %23, %24 : vector<1x1x32xi32>
    %cst_11 = arith.constant -1.000000e+09 : f32
    %26 = vector.shape_cast %25 : vector<1x1x32xi1> to vector<1x1x32xi1>
    %27 = vector.broadcast %26 : vector<1x1x32xi1> to vector<4x16x32xi1>
    %28 = vector.broadcast %cst_11 : f32 to vector<4x16x32xf32>
    %29 = arith.select %27, %28, %22 : vector<4x16x32xi1>, vector<4x16x32xf32>
    %cst_12 = arith.constant dense<0xFF800000> : vector<4x16xf32>
    %30 = vector.multi_reduction <maximumf>, %29, %cst_12 [2] : vector<4x16x32xf32> to vector<4x16xf32>
    %31 = vector.shape_cast %30 : vector<4x16xf32> to vector<4x16x1xf32>
    %32 = vector.broadcast %31 : vector<4x16x1xf32> to vector<4x16x32xf32>
    %33 = arith.subf %29, %32 : vector<4x16x32xf32>
    %34 = math.exp %33 : vector<4x16x32xf32>
    %cst_13 = arith.constant dense<0.000000e+00> : vector<4x16xf32>
    %35 = vector.multi_reduction <add>, %34, %cst_13 [2] : vector<4x16x32xf32> to vector<4x16xf32>
    %36 = vector.shape_cast %35 : vector<4x16xf32> to vector<4x16x1xf32>
    %37 = tpu.reciprocal %36 {approx = true} : vector<4x16x1xf32> -> vector<4x16x1xf32>
    %38 = vector.broadcast %37 : vector<4x16x1xf32> to vector<4x16x32xf32>
    %39 = arith.mulf %34, %38 : vector<4x16x32xf32>
    %40 = arith.truncf %39 : vector<4x16x32xf32> to vector<4x16x32xbf16>
    %c0_14 = arith.constant 0 : index
    %c0_15 = arith.constant 0 : index
    %c0_16 = arith.constant 0 : index
    %41 = vector.load %arg22[%c0_14, %c0_15, %c0_16] : memref<4x32x32xbf16, #tpu.memory_space<vmem>>, vector<4x32x32xbf16>
    "tpu.trace_start"() <{level = 10 : i32, message = "hqk,hkd->hqd"}> : () -> ()
    %cst_17 = arith.constant dense<0.000000e+00> : vector<4x16x32xf32>
    %42 = tpu.matmul %40, %41, %cst_17 {dimension_numbers = #tpu.dot_dimension_numbers<[2], [1], [1], [2], [0, 0, 0, 1, 1, 2], [0], [0]>} : vector<4x16x32xbf16>, vector<4x32x32xbf16>, vector<4x16x32xf32> -> vector<4x16x32xf32>
    "tpu.trace_stop"() : () -> ()
    %43 = tpu.transpose %42, [1, 0, 2] : vector<4x16x32xf32> -> vector<16x4x32xf32>
    %44 = vector.shape_cast %43 : vector<16x4x32xf32> to vector<16x128xf32>
    %45 = arith.truncf %44 : vector<16x128xf32> to vector<16x128xbf16>
    %c0_18 = arith.constant 0 : index
    %c0_19 = arith.constant 0 : index
    %46 = vector.load %arg10[%c0_18, %c0_19] : memref<128x128xbf16, #tpu.memory_space<vmem>>, vector<128x128xbf16>
    %cst_20 = arith.constant dense<0.000000e+00> : vector<16x128xf32>
    %47 = tpu.matmul %45, %46, %cst_20 {dimension_numbers = #tpu.dot_dimension_numbers<[1], [0], [0], [1], [0, 0, 1, 1], [], []>} : vector<16x128xbf16>, vector<128x128xbf16>, vector<16x128xf32> -> vector<16x128xf32>
    %c0_21 = arith.constant 0 : index
    %c0_22 = arith.constant 0 : index
    %48 = vector.load %arg11[%c0_21, %c0_22] : memref<1x128xf32, #tpu.memory_space<vmem>>, vector<1x128xf32>
    %49 = vector.broadcast %48 : vector<1x128xf32> to vector<16x128xf32>
    %50 = arith.addf %47, %49 : vector<16x128xf32>
    %51 = tpu.iota {dimensions = array<i32: 0>} : vector<16x1xi32>
    %52 = vector.broadcast %6 : i32 to vector<16x1xi32>
    %53 = arith.addi %52, %51 : vector<16x1xi32>
    %54 = vector.broadcast %1 : i32 to vector<16x1xi32>
    %55 = arith.cmpi slt, %53, %54 : vector<16x1xi32>
    %56 = arith.extui %55 : vector<16x1xi1> to vector<16x1xi32>
    %57 = arith.sitofp %56 : vector<16x1xi32> to vector<16x1xf32>
    %58 = arith.addf %50, %10 : vector<16x128xf32>
    %c0_23 = arith.constant 0 : index
    %c0_24 = arith.constant 0 : index
    %59 = vector.load %arg12[%c0_23, %c0_24] : memref<1x128xf32, #tpu.memory_space<vmem>>, vector<1x128xf32>
    %c0_25 = arith.constant 0 : index
    %c0_26 = arith.constant 0 : index
    %60 = vector.load %arg13[%c0_25, %c0_26] : memref<1x128xf32, #tpu.memory_space<vmem>>, vector<1x128xf32>
    %cst_27 = arith.constant dense<0.000000e+00> : vector<16xf32>
    %61 = vector.multi_reduction <add>, %58, %cst_27 [1] : vector<16x128xf32> to vector<16xf32>
    %62 = vector.shape_cast %61 : vector<16xf32> to vector<16x1xf32>
    %cst_28 = arith.constant 1.280000e+02 : f32
    %63 = vector.broadcast %cst_28 : f32 to vector<16x1xf32>
    %64 = arith.divf %62, %63 : vector<16x1xf32>
    %65 = vector.broadcast %64 : vector<16x1xf32> to vector<16x128xf32>
    %66 = arith.subf %58, %65 : vector<16x128xf32>
    %67 = arith.mulf %66, %66 : vector<16x128xf32>
    %cst_29 = arith.constant dense<0.000000e+00> : vector<16xf32>
    %68 = vector.multi_reduction <add>, %67, %cst_29 [1] : vector<16x128xf32> to vector<16xf32>
    %69 = vector.shape_cast %68 : vector<16xf32> to vector<16x1xf32>
    %cst_30 = arith.constant 1.280000e+02 : f32
    %70 = vector.broadcast %cst_30 : f32 to vector<16x1xf32>
    %71 = arith.divf %69, %70 : vector<16x1xf32>
    %72 = vector.broadcast %64 : vector<16x1xf32> to vector<16x128xf32>
    %73 = arith.subf %58, %72 : vector<16x128xf32>
    %cst_31 = arith.constant 9.99999974E-6 : f32
    %74 = vector.broadcast %cst_31 : f32 to vector<16x1xf32>
    %75 = arith.addf %71, %74 : vector<16x1xf32>
    %76 = math.rsqrt %75 : vector<16x1xf32>
    %77 = vector.broadcast %76 : vector<16x1xf32> to vector<16x128xf32>
    %78 = arith.mulf %73, %77 : vector<16x128xf32>
    %79 = vector.broadcast %59 : vector<1x128xf32> to vector<16x128xf32>
    %80 = arith.mulf %78, %79 : vector<16x128xf32>
    %81 = vector.broadcast %60 : vector<1x128xf32> to vector<16x128xf32>
    %82 = arith.addf %80, %81 : vector<16x128xf32>
    %83 = vector.broadcast %57 : vector<16x1xf32> to vector<16x128xf32>
    %84 = arith.mulf %82, %83 : vector<16x128xf32>
    %85 = arith.truncf %84 : vector<16x128xf32> to vector<16x128xbf16>
    %c0_32 = arith.constant 0 : index
    %c0_33 = arith.constant 0 : index
    %86 = vector.load %arg14[%c0_32, %c0_33] : memref<128x256xbf16, #tpu.memory_space<vmem>>, vector<128x256xbf16>
    %cst_34 = arith.constant dense<0.000000e+00> : vector<16x256xf32>
    %87 = tpu.matmul %85, %86, %cst_34 {dimension_numbers = #tpu.dot_dimension_numbers<[1], [0], [0], [1], [0, 0, 1, 1], [], []>} : vector<16x128xbf16>, vector<128x256xbf16>, vector<16x256xf32> -> vector<16x256xf32>
    %c0_35 = arith.constant 0 : index
    %c0_36 = arith.constant 0 : index
    %88 = vector.load %arg15[%c0_35, %c0_36] : memref<1x256xf32, #tpu.memory_space<vmem>>, vector<1x256xf32>
    %89 = vector.broadcast %88 : vector<1x256xf32> to vector<16x256xf32>
    %90 = arith.addf %87, %89 : vector<16x256xf32>
    %cst_37 = arith.constant 0.000000e+00 : f32
    %91 = vector.broadcast %cst_37 : f32 to vector<16x256xf32>
    %92 = arith.maximumf %90, %91 : vector<16x256xf32>
    %93 = arith.truncf %92 : vector<16x256xf32> to vector<16x256xbf16>
    %c0_38 = arith.constant 0 : index
    %c0_39 = arith.constant 0 : index
    %94 = vector.load %arg16[%c0_38, %c0_39] : memref<256x128xbf16, #tpu.memory_space<vmem>>, vector<256x128xbf16>
    %cst_40 = arith.constant dense<0.000000e+00> : vector<16x128xf32>
    %95 = tpu.matmul %93, %94, %cst_40 {dimension_numbers = #tpu.dot_dimension_numbers<[1], [0], [0], [1], [0, 0, 1, 1], [], []>} : vector<16x256xbf16>, vector<256x128xbf16>, vector<16x128xf32> -> vector<16x128xf32>
    %c0_41 = arith.constant 0 : index
    %c0_42 = arith.constant 0 : index
    %96 = vector.load %arg17[%c0_41, %c0_42] : memref<1x128xf32, #tpu.memory_space<vmem>>, vector<1x128xf32>
    %97 = vector.broadcast %96 : vector<1x128xf32> to vector<16x128xf32>
    %98 = arith.addf %95, %97 : vector<16x128xf32>
    %99 = arith.addf %98, %84 : vector<16x128xf32>
    %c0_43 = arith.constant 0 : index
    %c0_44 = arith.constant 0 : index
    %100 = vector.load %arg18[%c0_43, %c0_44] : memref<1x128xf32, #tpu.memory_space<vmem>>, vector<1x128xf32>
    %c0_45 = arith.constant 0 : index
    %c0_46 = arith.constant 0 : index
    %101 = vector.load %arg19[%c0_45, %c0_46] : memref<1x128xf32, #tpu.memory_space<vmem>>, vector<1x128xf32>
    %cst_47 = arith.constant dense<0.000000e+00> : vector<16xf32>
    %102 = vector.multi_reduction <add>, %99, %cst_47 [1] : vector<16x128xf32> to vector<16xf32>
    %103 = vector.shape_cast %102 : vector<16xf32> to vector<16x1xf32>
    %cst_48 = arith.constant 1.280000e+02 : f32
    %104 = vector.broadcast %cst_48 : f32 to vector<16x1xf32>
    %105 = arith.divf %103, %104 : vector<16x1xf32>
    %106 = vector.broadcast %105 : vector<16x1xf32> to vector<16x128xf32>
    %107 = arith.subf %99, %106 : vector<16x128xf32>
    %108 = arith.mulf %107, %107 : vector<16x128xf32>
    %cst_49 = arith.constant dense<0.000000e+00> : vector<16xf32>
    %109 = vector.multi_reduction <add>, %108, %cst_49 [1] : vector<16x128xf32> to vector<16xf32>
    %110 = vector.shape_cast %109 : vector<16xf32> to vector<16x1xf32>
    %cst_50 = arith.constant 1.280000e+02 : f32
    %111 = vector.broadcast %cst_50 : f32 to vector<16x1xf32>
    %112 = arith.divf %110, %111 : vector<16x1xf32>
    %113 = vector.broadcast %105 : vector<16x1xf32> to vector<16x128xf32>
    %114 = arith.subf %99, %113 : vector<16x128xf32>
    %cst_51 = arith.constant 9.99999974E-6 : f32
    %115 = vector.broadcast %cst_51 : f32 to vector<16x1xf32>
    %116 = arith.addf %112, %115 : vector<16x1xf32>
    %117 = math.rsqrt %116 : vector<16x1xf32>
    %118 = vector.broadcast %117 : vector<16x1xf32> to vector<16x128xf32>
    %119 = arith.mulf %114, %118 : vector<16x128xf32>
    %120 = vector.broadcast %100 : vector<1x128xf32> to vector<16x128xf32>
    %121 = arith.mulf %119, %120 : vector<16x128xf32>
    %122 = vector.broadcast %101 : vector<1x128xf32> to vector<16x128xf32>
    %123 = arith.addf %121, %122 : vector<16x128xf32>
    %124 = vector.broadcast %57 : vector<16x1xf32> to vector<16x128xf32>
    %125 = arith.mulf %123, %124 : vector<16x128xf32>
    %126 = arith.truncf %125 : vector<16x128xf32> to vector<16x128xbf16>
    %c0_52 = arith.constant 0 : index
    %c0_53 = arith.constant 0 : index
    %c0_54 = arith.constant 0 : index
    %127 = vector.load %arg20[%c0_52, %c0_53, %c0_54] : memref<1x16x128xbf16, #tpu.memory_space<vmem>>, vector<1x16x128xbf16>
    %128 = vector.shape_cast %127 : vector<1x16x128xbf16> to vector<16x128xbf16>
    %129 = vector.shape_cast %126 : vector<16x128xbf16> to vector<1x16x128xbf16>
    tpu.vector_store %arg20[%c0_52, %c0_53, %c0_54], %129 {strides = array<i32>} : memref<1x16x128xbf16, #tpu.memory_space<vmem>>, vector<1x16x128xbf16>,
    return
  }
  func.func @transform_0(%arg0: i32, %arg1: i32, %arg2: memref<2xi32, #tpu.memory_space<smem>>) -> (i32, i32, i32) {
    %c0_i32 = arith.constant 0 : i32
    %c0_i32_0 = arith.constant 0 : i32
    %c0_i32_1 = arith.constant 0 : i32
    return %arg0, %c0_i32, %c0_i32_0 : i32, i32, i32
  }
  func.func @transform_1(%arg0: i32, %arg1: i32, %arg2: memref<2xi32, #tpu.memory_space<smem>>) -> (i32, i32) {
    %c0_i32 = arith.constant 0 : i32
    %c0_i32_0 = arith.constant 0 : i32
    %c0_i32_1 = arith.constant 0 : i32
    return %c0_i32, %c0_i32_0 : i32, i32
  }
  func.func @transform_2(%arg0: i32, %arg1: i32, %arg2: memref<2xi32, #tpu.memory_space<smem>>) -> (i32, i32) {
    %c0_i32 = arith.constant 0 : i32
    %c0_i32_0 = arith.constant 0 : i32
    %c0_i32_1 = arith.constant 0 : i32
    return %c0_i32, %c0_i32_0 : i32, i32
  }
  func.func @transform_3(%arg0: i32, %arg1: i32, %arg2: memref<2xi32, #tpu.memory_space<smem>>) -> (i32, i32) {
    %c0_i32 = arith.constant 0 : i32
    %c0_i32_0 = arith.constant 0 : i32
    %c0_i32_1 = arith.constant 0 : i32
    return %c0_i32, %c0_i32_0 : i32, i32
  }
  func.func @transform_4(%arg0: i32, %arg1: i32, %arg2: memref<2xi32, #tpu.memory_space<smem>>) -> (i32, i32) {
    %c0_i32 = arith.constant 0 : i32
    %c0_i32_0 = arith.constant 0 : i32
    %c0_i32_1 = arith.constant 0 : i32
    return %c0_i32, %c0_i32_0 : i32, i32
  }
  func.func @transform_5(%arg0: i32, %arg1: i32, %arg2: memref<2xi32, #tpu.memory_space<smem>>) -> (i32, i32) {
    %c0_i32 = arith.constant 0 : i32
    %c0_i32_0 = arith.constant 0 : i32
    %c0_i32_1 = arith.constant 0 : i32
    return %c0_i32, %c0_i32_0 : i32, i32
  }
  func.func @transform_6(%arg0: i32, %arg1: i32, %arg2: memref<2xi32, #tpu.memory_space<smem>>) -> (i32, i32) {
    %c0_i32 = arith.constant 0 : i32
    %c0_i32_0 = arith.constant 0 : i32
    %c0_i32_1 = arith.constant 0 : i32
    return %c0_i32, %c0_i32_0 : i32, i32
  }
  func.func @transform_7(%arg0: i32, %arg1: i32, %arg2: memref<2xi32, #tpu.memory_space<smem>>) -> (i32, i32) {
    %c0_i32 = arith.constant 0 : i32
    %c0_i32_0 = arith.constant 0 : i32
    %c0_i32_1 = arith.constant 0 : i32
    return %c0_i32, %c0_i32_0 : i32, i32
  }
  func.func @transform_8(%arg0: i32, %arg1: i32, %arg2: memref<2xi32, #tpu.memory_space<smem>>) -> (i32, i32) {
    %c0_i32 = arith.constant 0 : i32
    %c0_i32_0 = arith.constant 0 : i32
    %c0_i32_1 = arith.constant 0 : i32
    return %c0_i32, %c0_i32_0 : i32, i32
  }
  func.func @transform_9(%arg0: i32, %arg1: i32, %arg2: memref<2xi32, #tpu.memory_space<smem>>) -> (i32, i32) {
    %c0_i32 = arith.constant 0 : i32
    %c0_i32_0 = arith.constant 0 : i32
    %c0_i32_1 = arith.constant 0 : i32
    return %c0_i32, %c0_i32_0 : i32, i32
  }
  func.func @transform_10(%arg0: i32, %arg1: i32, %arg2: memref<2xi32, #tpu.memory_space<smem>>) -> (i32, i32) {
    %c0_i32 = arith.constant 0 : i32
    %c0_i32_0 = arith.constant 0 : i32
    %c0_i32_1 = arith.constant 0 : i32
    return %c0_i32, %c0_i32_0 : i32, i32
  }
  func.func @transform_11(%arg0: i32, %arg1: i32, %arg2: memref<2xi32, #tpu.memory_space<smem>>) -> (i32, i32) {
    %c0_i32 = arith.constant 0 : i32
    %c0_i32_0 = arith.constant 0 : i32
    %c0_i32_1 = arith.constant 0 : i32
    return %c0_i32, %c0_i32_0 : i32, i32
  }
  func.func @transform_12(%arg0: i32, %arg1: i32, %arg2: memref<2xi32, #tpu.memory_space<smem>>) -> (i32, i32) {
    %c0_i32 = arith.constant 0 : i32
    %c0_i32_0 = arith.constant 0 : i32
    %c0_i32_1 = arith.constant 0 : i32
    return %c0_i32, %c0_i32_0 : i32, i32
  }
  func.func @transform_13(%arg0: i32, %arg1: i32, %arg2: memref<2xi32, #tpu.memory_space<smem>>) -> (i32, i32) {
    %c0_i32 = arith.constant 0 : i32
    %c0_i32_0 = arith.constant 0 : i32
    %c0_i32_1 = arith.constant 0 : i32
    return %c0_i32, %c0_i32_0 : i32, i32
  }
  func.func @transform_14(%arg0: i32, %arg1: i32, %arg2: memref<2xi32, #tpu.memory_space<smem>>) -> (i32, i32) {
    %c0_i32 = arith.constant 0 : i32
    %c0_i32_0 = arith.constant 0 : i32
    %c0_i32_1 = arith.constant 0 : i32
    return %c0_i32, %c0_i32_0 : i32, i32
  }
  func.func @transform_15(%arg0: i32, %arg1: i32, %arg2: memref<2xi32, #tpu.memory_space<smem>>) -> (i32, i32) {
    %c0_i32 = arith.constant 0 : i32
    %c0_i32_0 = arith.constant 0 : i32
    %c0_i32_1 = arith.constant 0 : i32
    return %c0_i32, %c0_i32_0 : i32, i32
  }
  func.func @transform_16(%arg0: i32, %arg1: i32, %arg2: memref<2xi32, #tpu.memory_space<smem>>) -> (i32, i32) {
    %c0_i32 = arith.constant 0 : i32
    %c0_i32_0 = arith.constant 0 : i32
    %c0_i32_1 = arith.constant 0 : i32
    return %c0_i32, %c0_i32_0 : i32, i32
  }
  func.func @transform_17(%arg0: i32, %arg1: i32, %arg2: memref<2xi32, #tpu.memory_space<smem>>) -> (i32, i32, i32) {
    %c0_i32 = arith.constant 0 : i32
    %c0_i32_0 = arith.constant 0 : i32
    return %arg0, %arg1, %c0_i32 : i32, i32, i32
  }
}

</mosaic_0001>

<bundles_post_ra>
// kernel: tpu_custom_call.1
= control target key start
LH: loop header
LB: loop body
LE: loop exit
PB: predicated region body
PF: predicated region fallthrough
CT: control target
= control target key end

     0   :  { %s6104_s0 = inlined_call_operand.hbm [shape: s32[2], index: 0, kind: input, shape index: {}]   ;;  %s6105_s1 = inlined_call_operand.hbm [shape: bf16[2,32,128], index: 1, kind: input, shape index: {}]   ;;  %s6106_s2 = inlined_call_operand.hbm [shape: bf16[128,128], index: 2, kind: input, shape index: {}]   ;;  %s6107_s3 = inlined_call_operand.vmem [shape: f32[1,128], index: 3, kind: input, shape index: {}]   ;;  %s6108_s4 = inlined_call_operand.hbm [shape: bf16[128,128], index: 4, kind: input, shape index: {}]   ;;  %s6109_s5 = inlined_call_operand.vmem [shape: f32[1,128], index: 5, kind: input, shape index: {}]   ;;  %s6110_s6 = inlined_call_operand.hbm [shape: bf16[128,128], index: 6, kind: input, shape index: {}]   ;;  %s6111_s7 = inlined_call_operand.vmem [shape: f32[1,128], index: 7, kind: input, shape index: {}]   ;;  %s6112_s8 = inlined_call_operand.hbm [shape: bf16[128,128], index: 8, kind: input, shape index: {}]   ;;  %s6113_s9 = inlined_call_operand.vmem [shape: f32[1,128], index: 9, kind: input, shape index: {}]   ;;  %s6114_s10 = inlined_call_operand.vmem [shape: f32[1,128], index: 10, kind: input, shape index: {}]   ;;  %s6115_s11 = inlined_call_operand.vmem [shape: f32[1,128], index: 11, kind: input, shape index: {}]   ;;  %s6116_s12 = inlined_call_operand.hbm [shape: bf16[128,256], index: 12, kind: input, shape index: {}]   ;;  %s6117_s13 = inlined_call_operand.vmem [shape: f32[1,256], index: 13, kind: input, shape index: {}]   ;;  %s6118_s14 = inlined_call_operand.hbm [shape: bf16[256,128], index: 14, kind: input, shape index: {}]   ;;  %s6119_s15 = inlined_call_operand.vmem [shape: f32[1,128], index: 15, kind: input, shape index: {}]   ;;  %s6120_s16 = inlined_call_operand.vmem [shape: f32[1,128], index: 16, kind: input, shape index: {}]   ;;  %s6121_s17 = inlined_call_operand.vmem [shape: f32[1,128], index: 17, kind: input, shape index: {}]   ;;  %s6122_s18 = inlined_call_operand.hbm [shape: bf16[2,32,128], index: 18, kind: output, shape index: {}]  }
   0x1   :  { %6140 = sst [smem:[#allocation30_spill]] %s6104_s0 }
   0x2   :  { %6141 = sst [smem:[#allocation31_spill]] %s6105_s1  ;;  %s6157_s29 = sld [smem:[#allocation30_spill]] }
   0x3   :  { %6142 = sst [smem:[#allocation32_spill]] %s6106_s2 }
   0x4   :  { %6143 = sst [smem:[#allocation33_spill]] %s6107_s3 }
   0x5   :  { %6144 = sst [smem:[#allocation34_spill]] %s6108_s4 }
   0x6   :  { %6145 = sst [smem:[#allocation35_spill]] %s6109_s5 }
   0x7   :  { %6146 = sst [smem:[#allocation36_spill]] %s6110_s6 }
   0x8   :  { %6147 = sst [smem:[#allocation37_spill]] %s6111_s7 }
   0x9   :  { %6148 = sst [smem:[#allocation38_spill]] %s6112_s8 }
   0xa   :  { %6149 = sst [smem:[#allocation39_spill]] %s6113_s9 }
   0xb   :  { %6150 = sst [smem:[#allocation40_spill]] %s6114_s10 }
   0xc   :  { %6151 = sst [smem:[#allocation41_spill]] %s6115_s11  ;;  %s4666_s11 = scalar_lea.hbm %s6157_s29, 16 }
   0xd   :  { %6152 = sst [smem:[#allocation42_spill]] %s6117_s13  ;;  %p4667_p0 = scmp.ne.s32.totalorder %s6157_s29, %s4666_s11 }
   0xe   :  { %6153 = sst [smem:[#allocation43_spill]] %s6119_s15  ;;  %p4670_p1 = scmp.lt.u32.totalorder %s4666_s11, %s6157_s29 }
   0xf   :  { %6154 = sst [smem:[#allocation44_spill]] %s6120_s16 }
  0x10   :  { %6155 = sst [smem:[#allocation45_spill]] %s6121_s17  ;;  %p4672_p2 = pnand %p4670_p1, %p4667_p0 }
  0x11   :  { %6156 = sst [smem:[#allocation46_spill]] %s6122_s18 }
  0x12   :  { %4675 = shalt.err (!%p4672_p2)  }
  0x13   :  { %s5012_s20 = smov [#allocation5]  }
  0x14   :  { %24 = dma.hbm_to_smem %s6157_s29, 16, %s5012_s20, [#allocation4] }
  0x15   :  { %4946 = dma.done.wait [#allocation4], 16 }
  0x16   :  { %4947 = vsyncadd [#allocation4], 4294967280 }
  0x17   :  { %26 = sfence }
  0x18   :  { %27 = vsyncpa [#allocation7], 0 }
  0x19   :  { %29 = vsyncpa [#allocation7 + $0x1], 0 }
  0x1a   :  { %30 = vsyncpa [#allocation10], 0 }
  0x1b   :  { %31 = vsyncpa [#allocation13], 0 }
  0x1c   :  { %32 = vsyncpa [#allocation16], 0 }
  0x1d   :  { %33 = vsyncpa [#allocation8], 0 }
  0x1e   :  { %35 = vsyncpa [#allocation8 + $0x1], 0  ;;  %s5147_s2 = smov 0   ;;  %s5149_s11 = smov 0  }
  0x1f   :  { %s5151_s23 = smov 0   ;;  %s5153_s24 = smov 0  }
  0x20   :  { %s5155_s25 = smov 0   ;;  %s5157_s26 = smov 0  }
  0x21   :  { %s5159_s27 = smov 0   ;;  %s5161_s28 = smov 0  }
  0x22   :  { %s5163_s29 = smov 0   ;;  %s5165_s30 = smov 0  }
  0x23   :  { %s5167_s0 = smov 0  }
  0x24 LB: > { %6158 = sst [smem:[#allocation25_spill]] %s4970_s2  ;;  %s3973_s19 = sadd.s32 4294967295, %s5010_s0   ;;  %s5010_s0 = sphi %s5167_s0, %s41_s0   ;;  %s5006_s30 = sphi %s5165_s30, %s6219_s30   ;;  %s5002_s29 = sphi %s5163_s29, %s6218_s29   ;;  %s4998_s28 = sphi %s5161_s28, %s6217_s28   ;;  %s4994_s27 = sphi %s5159_s27, %s6216_s27   ;;  %s4990_s26 = sphi %s5157_s26, %s6215_s26   ;;  %s4986_s25 = sphi %s5155_s25, %s6214_s25   ;;  %s4982_s24 = sphi %s5153_s24, %s6213_s24   ;;  %s4978_s23 = sphi %s5151_s23, %s6212_s23   ;;  %s4974_s11 = sphi %s5149_s11, %s6211_s11   ;;  %s4970_s2 = sphi %s5147_s2, %s6210_s2  }
  0x25   : > { %6159 = sst [smem:[#allocation26_spill]] %s4994_s27  ;;  %p3975_p3 = scmp.ge.s32.totalorder %s5010_s0, 1 }
  0x26   : > { %6160 = sst [smem:[#allocation27_spill]] %s4998_s28  ;;  %p5204_p4 = scmp.eq.s32.totalorder %s3973_s19, 0 }
  0x27   : > { %p5208_p5 = scmp.eq.s32.totalorder %s3973_s19, 3  ;;  %p448_p6 = scmp.lt.s32.totalorder %s5010_s0, 5 }
  0x28   : > { %s6161_s1 = scalar_select %p5204_p4, 1, 0 }
  0x29   : > { %s6162_s20 = scalar_select %p5208_p5, 1, 0 }
  0x2a   : > { %p5213_p7 = pnand %p3975_p3, %p448_p6  ;;  %s5013_s22 = smov [#allocation9]  }
  0x2b   : > { %6163 = sst [smem:[#allocation28_spill]] %s6162_s20  ;;  %s460_s18 = sshll.u32 %s5013_s22, 4  ;;  %s5217_s18 = int_to_ptr.vmem [resolvable:$true] %s460_s18 }
  0x2c   : > { %s6164_s21 = scalar_select %p5213_p7, 1, 0 }
  0x2d   : > { %p4380_p8 = pneg %p5213_p7  ;;  %s5014_s19 = smov [#allocation12]  }
  0x2e   : > { %6165 = sst [smem:[#allocation29_spill]] %s6164_s21  ;;  %s492_s16 = sshll.u32 %s5014_s19, 4  ;;  %s5227_s16 = int_to_ptr.vmem [resolvable:$true] %s492_s16 }
  0x2f   : > { %p5223_p9 = pnand %p4380_p8, %p5204_p4  ;;  %s5015_s15 = smov [#allocation15]  }
  0x30   : > { %s530_s13 = sshll.u32 %s5015_s15, 4  ;;  %s6167_s9 = sld [smem:[#allocation32_spill]]  ;;  %s5229_s13 = int_to_ptr.vmem [resolvable:$true] %s530_s13 }
  0x31   : > { %p5239_p11 = pneg %p5223_p9 }
  0x36   : > { %s4676_s3 = scalar_lea.hbm %s6167_s9, 1024 }
  0x37   : > { %p4677_p10 = scmp.ne.s32.totalorder %s6167_s9, %s4676_s3  ;;  %p4683_p0 = scmp.lt.u32.totalorder %s4676_s3, %s6167_s9 }
  0x39   : > { %p4679_p12 = pnand %p5239_p11, %p4677_p10 }
  0x3b   : > { %p4680_p13 = pneg %p4679_p12 }
  0x3d   : > { %p4685_p1 = pnand %p4683_p0, %p4680_p13 }
  0x3f   : > { %4688 = shalt.err (!%p4685_p1)
}
  0x40   : > { %s4689_s5 = scalar_lea.vmem %s5217_s18, 1024  ;;  %p4697_p8 = scmp.lt.s32.totalorder %s5217_s18, %s5217_s18 }
  0x41   : > { %p4690_p2 = scmp.ne.s32.totalorder %s5217_s18, %s4689_s5  ;;  %p4698_p7 = scmp.lt.s32.totalorder %s4689_s5, %s4689_s5 }
  0x43   : > { %p4692_p3 = pnand %p4690_p2, %p5239_p11  ;;  %p4699_p10 = por %p4698_p7, %p4697_p8 }
  0x45   : > { %p4693_p6 = pneg %p4692_p3 }
  0x47   : > { %p4700_p12 = pnand %p4699_p10, %p4693_p6 }
  0x49   : > { %4703 = shalt.err (!%p4700_p12)
}
  0x4a   : > { %s6131_s7 = smov 64   ;;  %s6133_s3 = smov 4  }
  0x4b   : > { %4383 = dma.hbm_to_vmem [thread:$0]  (!%p5223_p9), %s6167_s9, 1024, %s5217_s18, [#allocation10], %s6131_s7, %s6131_s7, %s6133_s3  }
  0x4c   : > { %s6169_s6 = sld [smem:[#allocation36_spill]] }
  0x52   : > { %s4704_s5 = scalar_lea.hbm %s6169_s6, 1024 }
  0x53   : > { %p4705_p7 = scmp.ne.s32.totalorder %s6169_s6, %s4704_s5  ;;  %p4711_p1 = scmp.lt.u32.totalorder %s4704_s5, %s6169_s6 }
  0x55   : > { %p4707_p13 = pnand %p4705_p7, %p5239_p11 }
  0x57   : > { %p4708_p0 = pneg %p4707_p13 }
  0x59   : > { %p4713_p2 = pnand %p4711_p1, %p4708_p0 }
  0x5b   : > { %4716 = shalt.err (!%p4713_p2)
}
  0x5c   : > { %s4717_s18 = scalar_lea.vmem %s5227_s16, 1024  ;;  %p4725_p10 = scmp.lt.s32.totalorder %s5227_s16, %s5227_s16 }
  0x5d   : > { %p4718_p3 = scmp.ne.s32.totalorder %s5227_s16, %s4717_s18  ;;  %p4726_p12 = scmp.lt.s32.totalorder %s4717_s18, %s4717_s18 }
  0x5f   : > { %p4720_p6 = pnand %p4718_p3, %p5239_p11  ;;  %p4727_p7 = por %p4726_p12, %p4725_p10 }
  0x61   : > { %p4721_p8 = pneg %p4720_p6 }
  0x63   : > { %p4728_p13 = pnand %p4727_p7, %p4721_p8 }
  0x65   : > { %4731 = shalt.err (!%p4728_p13)
}
  0x66   : > { %4389 = dma.hbm_to_vmem [thread:$0]  (!%p5223_p9), %s6169_s6, 1024, %s5227_s16, [#allocation13], %s6131_s7, %s6131_s7, %s6133_s3  }
  0x67   : > { %s4732_s10 = scalar_lea.hbm %s6116_s12, 2048 }
  0x68   : > { %p4733_p0 = scmp.ne.s32.totalorder %s6116_s12, %s4732_s10  ;;  %p4739_p3 = scmp.lt.u32.totalorder %s4732_s10, %s6116_s12 }
  0x6a   : > { %p4735_p1 = pnand %p4733_p0, %p5239_p11 }
  0x6c   : > { %p4736_p2 = pneg %p4735_p1 }
  0x6e   : > { %p4741_p6 = pnand %p4739_p3, %p4736_p2 }
  0x70   : > { %4744 = shalt.err (!%p4741_p6)
}
  0x71   : > { %s4745_s16 = scalar_lea.vmem %s5229_s13, 2048  ;;  %p4753_p7 = scmp.lt.s32.totalorder %s5229_s13, %s5229_s13 }
  0x72   : > { %p4746_p8 = scmp.ne.s32.totalorder %s5229_s13, %s4745_s16  ;;  %p4754_p13 = scmp.lt.s32.totalorder %s4745_s16, %s4745_s16 }
  0x74   : > { %p4748_p10 = pnand %p4746_p8, %p5239_p11  ;;  %p4755_p0 = por %p4754_p13, %p4753_p7 }
  0x76   : > { %p4749_p12 = pneg %p4748_p10 }
  0x78   : > { %p4756_p1 = pnand %p4755_p0, %p4749_p12 }
  0x7a   : > { %4759 = shalt.err (!%p4756_p1)
}
  0x7b   : > { %s5018_s18 = smov 128   ;;  %s5019_s2 = smov 8  }
  0x7c   : > { %4395 = dma.hbm_to_vmem [thread:$0]  (!%p5223_p9), %s6116_s12, 2048, %s5229_s13, [#allocation16], %s5018_s18, %s5018_s18, %s5019_s2  }
  0x7d   : > { %s5020_s21 = smov [#allocation11]   ;;  %s5021_s22 = smov [#allocation14]  }
  0x7e   : > { %s476_s10 = sshll.u32 %s5020_s21, 4  ;;  %s508_s15 = sshll.u32 %s5021_s22, 4  ;;  %s477_s10 = int_to_ptr.vmem [resolvable:$true] %s476_s10  ;;  %s5312_s15 = int_to_ptr.vmem [resolvable:$true] %s508_s15 }
  0x7f   : > { %s6170_s4 = sld [smem:[#allocation34_spill]] }
  0x85   : > { %s4760_s16 = scalar_lea.hbm %s6170_s4, 1024 }
  0x86   : > { %p4761_p2 = scmp.ne.s32.totalorder %s6170_s4, %s4760_s16  ;;  %p4767_p8 = scmp.lt.u32.totalorder %s4760_s16, %s6170_s4 }
  0x88   : > { %p4763_p3 = pnand %p4761_p2, %p5239_p11 }
  0x8a   : > { %p4764_p6 = pneg %p4763_p3 }
  0x8c   : > { %p4769_p10 = pnand %p4767_p8, %p4764_p6 }
  0x8e   : > { %4772 = shalt.err (!%p4769_p10)
}
  0x8f   : > { %s4773_s18 = scalar_lea.vmem %s477_s10, 1024  ;;  %p4781_p0 = scmp.lt.s32.totalorder %s477_s10, %s477_s10 }
  0x90   : > { %p4774_p12 = scmp.ne.s32.totalorder %s477_s10, %s4773_s18  ;;  %p4782_p1 = scmp.lt.s32.totalorder %s4773_s18, %s4773_s18 }
  0x92   : > { %p4776_p7 = pnand %p4774_p12, %p5239_p11  ;;  %p4783_p5 = por %p4782_p1, %p4781_p0 }
  0x94   : > { %p4777_p13 = pneg %p4776_p7 }
  0x96   : > { %p4784_p4 = pnand %p4783_p5, %p4777_p13 }
  0x98   : > { %4787 = shalt.err (!%p4784_p4)
}
  0x99   : > { %s6171_s7 = smov 4   ;;  %s6172_s3 = smov 64  }
  0x9a   : > { %4386 = dma.hbm_to_vmem [thread:$0]  (!%p5223_p9), %s6170_s4, 1024, %s477_s10, [#allocation10], %s6172_s3, %s6172_s3, %s6171_s7  }
  0x9b   : > { %s6173_s8 = sld [smem:[#allocation38_spill]] }
  0xa1   : > { %s4788_s19 = scalar_lea.hbm %s6173_s8, 1024 }
  0xa2   : > { %p4789_p2 = scmp.ne.s32.totalorder %s6173_s8, %s4788_s19  ;;  %p4795_p3 = scmp.lt.u32.totalorder %s4788_s19, %s6173_s8 }
  0xa4   : > { %p4791_p4 = pnand %p4789_p2, %p5239_p11 }
  0xa6   : > { %p4792_p5 = pneg %p4791_p4 }
  0xa8   : > { %p4797_p6 = pnand %p4795_p3, %p4792_p5 }
  0xaa   : > { %4800 = shalt.err (!%p4797_p6)
}
  0xab   : > { %s4801_s10 = scalar_lea.vmem %s5312_s15, 1024  ;;  %p4809_p7 = scmp.lt.s32.totalorder %s5312_s15, %s5312_s15 }
  0xac   : > { %p4802_p8 = scmp.ne.s32.totalorder %s5312_s15, %s4801_s10  ;;  %p4810_p13 = scmp.lt.s32.totalorder %s4801_s10, %s4801_s10 }
  0xae   : > { %p4804_p10 = pnand %p4802_p8, %p5239_p11  ;;  %p4811_p0 = por %p4810_p13, %p4809_p7 }
  0xb0   : > { %p4805_p12 = pneg %p4804_p10 }
  0xb2   : > { %p4812_p1 = pnand %p4811_p0, %p4805_p12 }
  0xb4   : > { %4815 = shalt.err (!%p4812_p1)
}
  0xb5   : > { %4392 = dma.hbm_to_vmem [thread:$0]  (!%p5223_p9), %s6173_s8, 1024, %s5312_s15, [#allocation13], %s6172_s3, %s6172_s3, %s6171_s7  }
  0xb6   : > { %s5022_s20 = smov [#allocation17]   ;;  %s4816_s5 = scalar_lea.hbm %s6118_s14, 2048 }
  0xb7   : > { %s546_s21 = sshll.u32 %s5022_s20, 4  ;;  %p4817_p2 = scmp.ne.s32.totalorder %s6118_s14, %s4816_s5  ;;  %s547_s21 = int_to_ptr.vmem [resolvable:$true] %s546_s21 }
  0xb8   : > { %p4823_p3 = scmp.lt.u32.totalorder %s4816_s5, %s6118_s14 }
  0xb9   : > { %p4819_p4 = pnand %p4817_p2, %p5239_p11 }
  0xbb   : > { %p4820_p5 = pneg %p4819_p4 }
  0xbd   : > { %p4825_p6 = pnand %p4823_p3, %p4820_p5 }
  0xbf   : > { %4828 = shalt.err (!%p4825_p6)
}
  0xc0   : > { %s4829_s15 = scalar_lea.vmem %s547_s21, 2048  ;;  %p4837_p7 = scmp.lt.s32.totalorder %s547_s21, %s547_s21 }
  0xc1   : > { %p4830_p8 = scmp.ne.s32.totalorder %s547_s21, %s4829_s15  ;;  %p4838_p13 = scmp.lt.s32.totalorder %s4829_s15, %s4829_s15 }
  0xc3   : > { %p4832_p10 = pnand %p4830_p8, %p5239_p11  ;;  %p4839_p0 = por %p4838_p13, %p4837_p7 }
  0xc5   : > { %p4833_p12 = pneg %p4832_p10 }
  0xc7   : > { %p4840_p1 = pnand %p4839_p0, %p4833_p12 }
  0xc9   : > { %4843 = shalt.err (!%p4840_p1)
}
  0xca   : > { %4398 = dma.hbm_to_vmem [thread:$0]  (!%p5223_p9), %s6118_s14, 2048, %s547_s21, [#allocation16], %s6172_s3, %s6172_s3, %s6171_s7  }
  0xcb   : > { %s3974_s17 = sadd.s32 4294967294, %s5010_s0   ;;  %s50_s27 = sadd.s32 1, %s5002_s29 }
  0xcc   : > { %s6174_s20 = sld [smem:[#allocation25_spill]]  ;;  %s53_s22 = sadd.s32 1, %s5006_s30 }
  0xcd   : > { %p51_p11 = scmp.ge.s32.totalorder %s50_s27, 2  ;;  %s60_s19 = sadd.s32 1, %s4990_s26 }
  0xce   : > { %p67_p2 = scmp.ne.s32.totalorder %s4990_s26, %s4986_s25  ;;  %p68_p4 = scmp.eq.s32.totalorder %s5010_s0, 0 }
  0xcf   : > { %s6221_s27 = smov (%p51_p11, %s50_s27), 0  ;;  %s6175_s5 = sld [smem:[#allocation28_spill]] }
  0xd0   : > { %s6223_s22 = smov (!%p51_p11, %s53_s22), %s5006_s30  ;;  %p5392_p5 = por %p68_p4, %p67_p2 }
  0xd1   : > { %p73_p9 = scmp.ne.s32.totalorder %s4986_s25, %s4982_s24  ;;  %p55_p3 = scmp.ge.s32.totalorder %s6223_s22, 2 }
  0xd2   : > { %s420_s16 = ssub.s32 %s5002_s29, %s6221_s27  ;;  %p6177_p6 = scmp.ne.s32.totalorder %s6161_s1, 0 }
  0xd3   : > { %s424_s13 = sadd.s32 1, %s4978_s23  ;;  %s6225_s22 = smov (%p55_p3, %s6223_s22), 0 }
  0xd4   : > { %p5402_p8 = por %p6177_p6, %p73_p9  ;;  %p434_p10 = scmp.ne.s32.totalorder %s4978_s23, %s4974_s11 }
  0xd5   : > { %p440_p12 = scmp.ne.s32.totalorder %s4974_s11, %s6174_s20  ;;  %s57_s10 = ssub.s32 %s5006_s30, %s6225_s22 }
  0xd6   : > { %p441_p7 = scmp.eq.s32.totalorder %s3974_s17, 3  ;;  %p58_p13 = scmp.eq.s32.totalorder %s57_s10, 0 }
  0xd7   : > { %s421_s24 = sor.u32 %s420_s16, %s57_s10  ;;  %p6179_p1 = scmp.ne.s32.totalorder %s6175_s5, 0 }
  0xd8   : > { %p422_p0 = scmp.eq.s32.totalorder %s421_s24, 0  ;;  %p5427_p2 = por %p441_p7, %p440_p12 }
  0xd9   : > { %p5417_p11 = por %p6179_p1, %p434_p10  ;;  %p4413_p4 = scmp.lt.s32.totalorder %s5010_s0, 4 }
  0xda   : > { %s5422_s18 = scalar_select %p58_p13, %s4990_s26, %s60_s19  }
  0xdb   : > { %s6180_s15 = scalar_select %p5417_p11, 1, 0 }
  0xdc   : > { %s5425_s2 = scalar_select %p422_p0, %s4978_s23, %s424_s13  }
  0xdd   : > { %s6181_s4 = scalar_select %p5427_p2, 1, 0 }
  0xde   : > { %s569_s20 = sand.u32 1, %s4990_s26   ;;  %s4116_s6 = sshll.u32 %s5006_s30, 8 }
  0xdf   : > { %s3983_s17 = sshll.u32 %s569_s20, 4  ;;  %s6182_s10 = sld [smem:[#allocation31_spill]] }
  0xe0   : > { %s573_s19 = scalar_lea.vmem [#allocation6], %s3983_s17  ;;  %p5441_p9 = pnand %p4413_p4, %p5392_p5 }
  0xe1   : > { %s580_s13 = sshll.u32 %s573_s19, 4  ;;  %s5447_s9 = scalar_lea.sflag [#allocation7], %s569_s20  ;;  %s5445_s13 = int_to_ptr.vmem [resolvable:$true] %s580_s13 }
  0xe2   : > { %p4846_p6 = pneg %p5441_p9 }
  0xe5   : > { %s5437_s5 = scalar_lea.hbm %s6182_s10, %s4116_s6  ;;  %s4849_s17 = scalar_lea.hbm %s6182_s10, 512 }
  0xe6   : > { %s4844_s8 = scalar_lea.hbm %s5437_s5, 256  ;;  %p4850_p5 = scmp.lt.u32.totalorder %s5437_s5, %s6182_s10 }
  0xe7   : > { %p4845_p3 = scmp.ne.s32.totalorder %s5437_s5, %s4844_s8  ;;  %p4851_p7 = scmp.lt.u32.totalorder %s4849_s17, %s4844_s8 }
  0xe8   : > { %p4853_p0 = scmp.lt.u32.totalorder %s4844_s8, %s5437_s5 }
  0xe9   : > { %p4847_p10 = pnand %p4846_p6, %p4845_p3  ;;  %p4852_p13 = por %p4851_p7, %p4850_p5 }
  0xeb   : > { %p4848_p12 = pneg %p4847_p10  ;;  %p4854_p1 = por %p4853_p0, %p4852_p13 }
  0xed   : > { %p4855_p4 = pnand %p4854_p1, %p4848_p12 }
  0xef   : > { %4858 = shalt.err (!%p4855_p4)
}
  0xf0   : > { %s4859_s20 = scalar_lea.vmem %s5445_s13, 256  ;;  %s5023_s6 = smov [#allocation6]  }
  0xf1   : > { %p4860_p3 = scmp.ne.s32.totalorder %s5445_s13, %s4859_s20  ;;  %s4864_s21 = sshll.u32 %s5023_s6, 4  ;;  %s4865_s21 = int_to_ptr.vmem [resolvable:$false] %s4864_s21 }
  0xf2   : > { %s4866_s16 = scalar_lea.vmem %s4865_s21, 512  ;;  %p4867_p11 = scmp.lt.s32.totalorder %s5445_s13, %s4865_s21 }
  0xf3   : > { %p4862_p10 = pnand %p4860_p3, %p4846_p6  ;;  %p4868_p5 = scmp.lt.s32.totalorder %s4866_s16, %s4859_s20 }
  0xf5   : > { %p4863_p2 = pneg %p4862_p10  ;;  %p4869_p7 = por %p4868_p5, %p4867_p11 }
  0xf7   : > { %p4870_p13 = pnand %p4869_p7, %p4863_p2 }
  0xf9   : > { %4873 = shalt.err (!%p4870_p13)
}
  0xfa   : > { %4402 = dma.hbm_to_vmem [thread:$0]  (!%p5441_p9), %s5437_s5, 256, %s5445_s13, %s5447_s9, %s6172_s3, %s6172_s3, %s6171_s7  }
  0xfb   : > { %s6184_s8 = sld [smem:[#allocation29_spill]] }
 0x101   : > { %p6185_p6 = scmp.ne.s32.totalorder %s6184_s8, 0 }
 0x102   : > { %s594_s17 = sand.u32 (!%p6185_p6), 1, %s4986_s25  }
 0x103   : > { %592 = sbr.rel (%p6185_p6) target bundleno = 3374 (0xd2e), region = 88  ;;  %s3987_s19 = sshll.u32 (!%p6185_p6), %s594_s17, 4 }
 0x104   : > { %s595_s20 = scalar_lea.sflag (!%p6185_p6), [#allocation7], %s594_s17  ;;  %s5481_s6 = scalar_lea.vmem (!%p6185_p6), [#allocation6], %s3987_s19 }
 0x10a   : > { %4949 = dma.done.wait (%p5402_p8), %s595_s20, 256  }
 0x10b   : > { %4951 = vsyncadd (%p5402_p8), %s595_s20, 4294967040  ;;  %p6186_p11 = scmp.ne.s32.totalorder %s6161_s1, 0 }
 0x10d   : > { %4953 = dma.done.wait (%p6186_p11), [#allocation10], 2048  }
 0x10e   : > { %4955 = vsyncadd (%p6186_p11), [#allocation10], 4294965248 }
 0x10f   : > { %4957 = dma.done.wait (%p6186_p11), [#allocation13], 2048  }
 0x110   : > { %4959 = vsyncadd (%p6186_p11), [#allocation13], 4294965248 }
 0x111   : > { %4961 = dma.done.wait (%p6186_p11), [#allocation16], 4096  }
 0x112   : > { %4963 = vsyncadd (%p6186_p11), [#allocation16], 4294963200  ;;  %s6187_s9 = sld [smem:[#allocation27_spill]]  ;;  %s670_s7 = sand.u32 1, %s4974_s11  }
 0x113   : > { %s5505_s28 = sshll.u32 %s670_s7, 3  ;;  %s6188_s13 = sld [smem:[#allocation26_spill]] }
 0x114   : > { %s672_s5 = scalar_lea.vmem [#allocation18], %s5505_s28 }
 0x118   : > { %s5501_s3 = sld [smem:[#allocation5 + %s6187_s9]] }
 0x119   : > { %p3995_p8 = scmp.ne.s32.totalorder %s6188_s13, 0 }
 0x11a   : > { %v4535_v0 = vld [vmem:[#allocation11] sm:$0xff] (!%p3995_p8)   ;;  %v4536_v1 = vld [vmem:[#allocation11 + $0x8] sm:$0xff] (!%p3995_p8)   ;;  %v4538_v3 = vld [vmem:[#allocation11 + $0x10] sm:$0xff] (!%p3995_p8)   ;;  %s6189_s21 = sld [smem:[#allocation35_spill]] (!%p3995_p8)  ;;  %s6190_s17 = sld [smem:[#allocation37_spill]] (!%p3995_p8)  ;;  %v994_v42 = vlaneseq (!%p3995_p8)  ;;  %v5029_v47 = vmov (!%p3995_p8), 0  }
 0x11b   : > { %679 = sbr.rel (%p3995_p8) target bundleno = 731 (0x2db), region = 120  ;;  %4208 = vmatprep.subr.bf16.mxu0 (!%p3995_p8), %v4535_v0  ;;  %v4537_v2 = vld [vmem:[#allocation12] sm:$0xff] (!%p3995_p8)   ;;  %v4539_v4 = vld [vmem:[#allocation12 + $0x8] sm:$0xff] (!%p3995_p8)   ;;  %v4541_v5 = vld [vmem:[#allocation12 + $0x10] sm:$0xff] (!%p3995_p8)   ;;  %s5024_s19 = smov (!%p3995_p8), 64   ;;  %v5527_v48 = vpack.i.b16 (!%p3995_p8), %v5029_v47, %v5029_v47  ;;  %vm1486_vm0 = vcmask (!%p3995_p8), 261120  }
 0x11c   : > { %4209 = vmatpush3.bf16.msra.mxu0 (!%p3995_p8), %v4535_v0  ;;  %4228 = vmatprep.subr.bf16.mxu1 (!%p3995_p8), %v4537_v2  ;;  %v4540_v6 = vld [vmem:[#allocation11 + $0x18] sm:$0xff] (!%p3995_p8)   ;;  %v4542_v8 = vld [vmem:[#allocation11 + $0x20] sm:$0xff] (!%p3995_p8)   ;;  %v4544_v11 = vld [vmem:[#allocation11 + $0x28] sm:$0xff] (!%p3995_p8)   ;;  %s5025_s20 = smov (!%p3995_p8), 96   ;;  %s5026_s9 = smov (!%p3995_p8), 32   ;;  %v995_v46 = vshrl.u32 (!%p3995_p8), %v994_v42, 7 }
 0x11d   : > { %4210 = vmatprep.subr.bf16.mxu0 (!%p3995_p8), %v4536_v1  ;;  %4229 = vmatpush3.bf16.msra.mxu1 (!%p3995_p8), %v4537_v2  ;;  %v4543_v7 = vld [vmem:[#allocation12 + $0x18] sm:$0xff] (!%p3995_p8)   ;;  %v4545_v9 = vld [vmem:[#allocation12 + $0x20] sm:$0xff] (!%p3995_p8)   ;;  %v4547_v12 = vld [vmem:[#allocation12 + $0x28] sm:$0xff] (!%p3995_p8)   ;;  %v5027_v40 = vmov (!%p3995_p8), 1983009808  }
 0x11e   : > { %4230 = vmatprep.subr.bf16.mxu1 (!%p3995_p8), %v4539_v4  ;;  %v4550_v10 = vld [vmem:[%s5481_s6] sm:$0xff] (!%p3995_p8)   ;;  %v4548_v15 = vld [vmem:[#allocation11 + $0x38] sm:$0xff] (!%p3995_p8)   ;;  %v992_v41 = vunpack.c.l.s4 (!%p3995_p8), %v5027_v40  ;;  %v5028_v43 = vmov (!%p3995_p8), 1934713408  }
 0x11f   : > { %4224 = vmatprep.mubr.bf16.mxu0 (!%p3995_p8), %v4550_v10  ;;  %4244 = vmatprep.mubr.bf16.mxu1 (!%p3995_p8), %v4550_v10  ;;  %v4546_v13 = vld [vmem:[#allocation11 + $0x30] sm:$0xff] (!%p3995_p8)   ;;  %v4552_v16 = vld [vmem:[#allocation12 + $0x38] sm:$0xff] (!%p3995_p8)   ;;  %v1023_v44 = vunpack.c.l.s4 (!%p3995_p8), %v5028_v43 }
 0x120   : > { %4211 = vmatpush3.bf16.msra.mxu0 (!%p3995_p8), %v4536_v1  ;;  %v4549_v14 = vld [vmem:[#allocation12 + $0x30] sm:$0xff] (!%p3995_p8)   ;;  %v4551_v17 = vld [vmem:[%s5481_s6 + $0x8] sm:$0xff] (!%p3995_p8)   ;;  %v993_v45 = vunpack.c.0.s8 (!%p3995_p8), %v992_v41 }
 0x121   : > { %4212 = vmatprep.subr.bf16.mxu0 (!%p3995_p8), %v4538_v3  ;;  %4231 = vmatpush3.bf16.msra.mxu1 (!%p3995_p8), %v4539_v4  ;;  %v3996_v19 = vld [vmem:[%s6189_s21] ss:$0 sm:$0xff] (!%p3995_p8)  ;;  %v1024_v51 = vunpack.c.0.s8 (!%p3995_p8), %v1023_v44 }
 0x122   : > { %4232 = vmatprep.subr.bf16.mxu1 %v4541_v5  ;;  %v4007_v20 = vld [vmem:[%s6190_s17] ss:$0 sm:$0xff]  ;;  %v5529_v55 = vsub.s32 %v993_v45, %v995_v46 }
 0x123   : > { %v5532_v58 = vsub.s32 %v1024_v51, %v995_v46 }
 0x124   : > { %4213 = vmatpush3.bf16.msra.mxu0 %v4538_v3 }
 0x125   : > { %4214 = vmatprep.subr.bf16.mxu0 %v4540_v6  ;;  %4233 = vmatpush3.bf16.msra.mxu1 %v4541_v5 }
 0x126   : > { %4234 = vmatprep.subr.bf16.mxu1 %v4543_v7 }
 0x128   : > { %4215 = vmatpush3.bf16.msra.mxu0 %v4540_v6 }
 0x129   : > { %4216 = vmatprep.subr.bf16.mxu0 %v4542_v8  ;;  %4235 = vmatpush3.bf16.msra.mxu1 %v4543_v7 }
 0x12a   : > { %4236 = vmatprep.subr.bf16.mxu1 %v4545_v9 }
 0x12c   : > { %4217 = vmatpush3.bf16.msra.mxu0 %v4542_v8 }
 0x12d   : > { %4218 = vmatprep.subr.bf16.mxu0 %v4544_v11  ;;  %4237 = vmatpush3.bf16.msra.mxu1 %v4545_v9 }
 0x12e   : > { %4238 = vmatprep.subr.bf16.mxu1 %v4547_v12 }
 0x130   : > { %4219 = vmatpush3.bf16.msra.mxu0 %v4544_v11 }
 0x131   : > { %4220 = vmatprep.subr.bf16.mxu0 %v4546_v13  ;;  %4239 = vmatpush3.bf16.msra.mxu1 %v4547_v12 }
 0x132   : > { %4240 = vmatprep.subr.bf16.mxu1 %v4549_v14 }
 0x134   : > { %4221 = vmatpush3.bf16.msra.mxu0 %v4546_v13 }
 0x135   : > { %4222 = vmatprep.subr.bf16.mxu0 %v4548_v15  ;;  %4241 = vmatpush3.bf16.msra.mxu1 %v4549_v14 }
 0x136   : > { %4242 = vmatprep.subr.bf16.mxu1 %v4552_v16 }
 0x138   : > { %4223 = vmatpush3.bf16.msra.mxu0 %v4548_v15 }
 0x139   : > { %4243 = vmatpush3.bf16.msra.mxu1 %v4552_v16 }
 0x13b   : > { %4225 = vmatmul.mubr.bf16.vlgmr.msra.gmra.mrb[0].mxu0 %v4551_v17 }
 0x13c   : > { %4245 = vmatmul.mubr.bf16.vlgmr.msra.gmra.mrb[0].mxu1 %v4551_v17 }
 0x20e   : > { %v4226_v18 = vpop.f32.mrb[0].mxu0 }
 0x20f   : > { %v801_v21 = vpop.f32.mrb[1].mxu0  ;;  %v4246_v23 = vpop.f32.mrb[0].mxu1  ;;  %v810_v24 = vadd.f32 %v4226_v18, %v3996_v19 }
 0x210   : > { %v4227_v22 = vpop.f32.mrb[2].mxu0  ;;  %v930_v27 = vadd.f32 %v4246_v23, %v4007_v20  ;;  %v921_v28 = vpop.f32.mrb[1].mxu1  ;;  %v802_v29 = vadd.f32 %v3996_v19, %v801_v21 }
 0x211   : > { %v813_v25 = vadd.f32 %v4227_v22, %v3996_v19  ;;  %v804_v26 = vpop.f32.mrb[3].mxu0  ;;  %v922_v31 = vadd.f32 %v4007_v20, %v921_v28  ;;  %v4247_v32 = vpop.f32.mrb[2].mxu1 }
 0x212   : > { %v805_v30 = vadd.f32 %v3996_v19, %v804_v26  ;;  %v933_v34 = vadd.f32 %v4247_v32, %v4007_v20  ;;  %v924_v35 = vpop.f32.mrb[3].mxu1 }
 0x213   : > { %v937_v33 = vpack.c.bf16 %v813_v25, %v810_v24  ;;  %v925_v37 = vadd.f32 %v4007_v20, %v924_v35 }
 0x214   : > { %v936_v36 = vpack.c.bf16 %v805_v30, %v802_v29  ;;  %v5517_v38 = vpack.c.bf16 %v933_v34, %v930_v27 }
 0x215   : > { %946 = vrot.lane.b32.xlu1 %v937_v33, %s5024_s19  ;;  %942 = vrot.lane.b32.xlu0 %v937_v33, %s5025_s20  ;;  %v5519_v39 = vpack.c.bf16 %v925_v37, %v922_v31  ;;  %v978_v53 = vshrl.u32 %v937_v33, 16 }
 0x216   : > { %v956_v61 = vshrl.u32 %v936_v36, 16  ;;  %v1531_v62 = vshrl.u32 %v5517_v38, 16 }
 0x217   : > { %v1515_v2 = vshrl.u32 %v5519_v39, 16 }
 0x219   : > { %950 = vrot.lane.b32.xlu1 %v937_v33, %s5026_s9  ;;  %940 = vrot.lane.b32.xlu0 %v936_v36, %s5025_s20 }
 0x21d   : > { %1501 = vrot.lane.b32.xlu1 %v5517_v38, %s5025_s20  ;;  %948 = vrot.lane.b32.xlu0 %v936_v36, %s5026_s9 }
 0x221   : > { %1505 = vrot.lane.b32.xlu1 %v5517_v38, %s5024_s19  ;;  %1499 = vrot.lane.b32.xlu0 %v5519_v39, %s5025_s20 }
 0x225   : > { %944 = vrot.lane.b32.xlu1 %v936_v36, %s5024_s19  ;;  %1503 = vrot.lane.b32.xlu0 %v5519_v39, %s5024_s19 }
 0x229   : > { %1509 = vrot.lane.b32.xlu1 %v5517_v38, %s5026_s9  ;;  %1507 = vrot.lane.b32.xlu0 %v5519_v39, %s5026_s9 }
 0x287   : > { %v947_v49 = vpop.permute.xlu1 %946  ;;  %v943_v50 = vpop.permute.xlu0 %942 }
 0x288   : > { %v976_v52 = vpack.i.b16 %v943_v50, %v937_v33  ;;  %v979_v54 = vshrl.u32 %v943_v50, 16  ;;  %v986_v63 = vshrl.u32 %v947_v49, 16 }
 0x28a   : > { %v980_v56 = vpack.i.b16 %v979_v54, %v978_v53  ;;  %v1122_v57 = vcombine.high %v976_v52, %v5527_v48  ;;  %v1129_v3 = vrot.slane %v976_v52, %v5529_v55 }
 0x28b   : > { %v951_v59 = vpop.permute.xlu1 %950  ;;  %v941_v60 = vpop.permute.xlu0 %940 }
 0x28c   : > { %v1188_v0 = vcombine.high %v980_v56, %v5527_v48  ;;  %v984_v1 = vpack.i.b16 %v951_v59, %v947_v49  ;;  %v987_v4 = vshrl.u32 %v951_v59, 16  ;;  %v954_v5 = vpack.i.b16 %v941_v60, %v936_v36 }
 0x28d   : > { %v957_v6 = vshrl.u32 %v941_v60, 16  ;;  %v1136_v7 = vrot.slane %v1122_v57, %v5529_v55  ;;  %v1195_v8 = vrot.slane %v980_v56, %v5529_v55 }
 0x28e   : > { %v1137_v9 = vcombine.high %v984_v1, %v5527_v48  ;;  %v1144_v10 = vrot.slane %v984_v1, %v5529_v55  ;;  %v1202_v11 = vrot.slane %v1188_v0, %v5529_v55  ;;  %v988_v12 = vpack.i.b16 %v987_v4, %v986_v63 }
 0x28f   : > { %v958_v13 = vpack.i.b16 %v957_v6, %v956_v61  ;;  %v990_v14 = vcombine.high %v954_v5, %v5527_v48  ;;  %v1502_v15 = vpop.permute.xlu1 %1501  ;;  %v5546_v19 = vrot.slane %v954_v5, %v5529_v55  ;;  %v5560_v36 = vpop.permute.xlu0 %948 }
 0x290   : > { %v1151_v16 = vrot.slane %v1137_v9, %v5529_v55  ;;  %v1152_v17 = vcombine.low %v1129_v3, %v1144_v10  ;;  %v1153_v18 = vcombine.high %v1129_v3, %v1144_v10  ;;  %v1203_v20 = vcombine.high %v988_v12, %v5527_v48 }
 0x291   : > { %v1210_v21 = vrot.slane %v988_v12, %v5529_v55  ;;  %v5551_v22 = vrot.slane %v990_v14, %v5529_v55  ;;  %v1529_v23 = vpack.i.b16 %v1502_v15, %v5517_v38  ;;  %v1056_v31 = vcombine.high %v958_v13, %v5527_v48 }
 0x292   : > { %v1160_v24 = vrot.slane %v1152_v17, %v5532_v58  ;;  %v1167_v25 = vrot.slane %v1153_v18, %v5532_v58  ;;  %v1168_v26 = vcombine.low %v1136_v7, %v1151_v16  ;;  %v1169_v27 = vcombine.high %v1136_v7, %v1151_v16 }
 0x293   : > { %v1217_v28 = vrot.slane %v1203_v20, %v5529_v55  ;;  %v1218_v29 = vcombine.low %v1195_v8, %v1210_v21  ;;  %v1219_v30 = vcombine.high %v1195_v8, %v1210_v21  ;;  %v5568_v52 = vpop.permute.xlu1 %1505  ;;  %v5573_v57 = vrot.slane %v958_v13, %v5529_v55  ;;  %v1500_v5 = vpop.permute.xlu0 %1499 }
 0x294   : > { %v1176_v32 = vrot.slane %v1168_v26, %v5532_v58  ;;  %v1183_v33 = vrot.slane %v1169_v27, %v5532_v58  ;;  %v1354_v34 = vcombine.low %v1160_v24, %v1167_v25  ;;  %v4020_v35 = vcombine.high %v1160_v24, %v1167_v25 }
 0x295   : > { %v1226_v37 = vrot.slane %v1218_v29, %v5532_v58  ;;  %v1233_v40 = vrot.slane %v1219_v30, %v5532_v58  ;;  %v1234_v41 = vcombine.low %v1202_v11, %v1217_v28  ;;  %v1235_v42 = vcombine.high %v1202_v11, %v1217_v28 }
 0x296   : > { %v1361_v43 = vrot.slane %v1354_v34, %v5529_v55  ;;  %v1369_v44 = vrot.slane %v4020_v35, %v5529_v55  ;;  %v1370_v45 = vcombine.low %v1176_v32, %v1183_v33  ;;  %v4021_v46 = vcombine.high %v1176_v32, %v1183_v33 }
 0x297   : > { %v1242_v47 = vrot.slane %v1234_v41, %v5532_v58  ;;  %v1249_v49 = vrot.slane %v1235_v42, %v5532_v58  ;;  %v1404_v50 = vcombine.low %v1226_v37, %v1233_v40  ;;  %v4022_v51 = vcombine.high %v1226_v37, %v1233_v40  ;;  %v945_v18 = vpop.permute.xlu1 %944  ;;  %v5614_v35 = vpop.permute.xlu0 %1503 }
 0x298   : > { %v1377_v53 = vrot.slane %v1370_v45, %v5529_v55  ;;  %v1385_v54 = vrot.slane %v4021_v46, %v5529_v55  ;;  %v1386_v56 = vcombine.low %v1361_v43, %v1369_v44  ;;  %v5578_v1 = vrot.slane %v1056_v31, %v5529_v55 }
 0x299   : > { %v1411_v59 = vrot.slane %v1404_v50, %v5529_v55  ;;  %v1419_v60 = vrot.slane %v4022_v51, %v5529_v55  ;;  %v1420_v61 = vcombine.low %v1242_v47, %v1249_v49  ;;  %v4023_v63 = vcombine.high %v1242_v47, %v1249_v49 }
 0x29a   : > { %v1394_v0 = vcombine.low %v1377_v53, %v1385_v54  ;;  %v1532_v3 = vshrl.u32 %v1502_v15, 16  ;;  %v1675_v4 = vcombine.high %v1529_v23, %v5527_v48  ;;  %v1393_v6 = vrot.slane %v1386_v56, %v5532_v58 }
 0x29b   : > { %v1427_v7 = vrot.slane %v1420_v61, %v5529_v55  ;;  %v1435_v8 = vrot.slane %v4023_v63, %v5529_v55  ;;  %v1436_v9 = vcombine.low %v1411_v59, %v1419_v60  ;;  %v5588_v12 = vrot.slane %v1529_v23, %v5529_v55  ;;  %v1510_v49 = vpop.permute.xlu1 %1509 }
 0x29c   : > { %v1401_v10 = vrot.slane %v1394_v0, %v5532_v58  ;;  %v1533_v11 = vpack.i.b16 %v1532_v3, %v1531_v62  ;;  %v5591_v13 = vrot.slane %v1675_v4, %v5529_v55  ;;  %v965_v16 = vshrl.u32 %v5560_v36, 16 }
 0x29d   : > { %v1443_v14 = vrot.slane %v1436_v9, %v5532_v58  ;;  %v1444_v15 = vcombine.low %v1427_v7, %v1435_v8  ;;  %v1513_v17 = vpack.i.b16 %v1500_v5, %v5519_v39  ;;  %v1539_v38 = vshrl.u32 %v5568_v52, 16 }
 0x29e   : > { %v1402_v20 = vcombine.low %v1393_v6, %v1401_v10  ;;  %v1403_v21 = vcombine.high %v1393_v6, %v1401_v10  ;;  %v1741_v24 = vcombine.high %v1533_v11, %v5527_v48  ;;  %v5600_v23 = vrot.slane %v1533_v11, %v5529_v55 }
 0x29f   : > { %v1451_v62 = vrot.slane %v1444_v15, %v5532_v58  ;;  %v1516_v25 = vshrl.u32 %v1500_v5, 16  ;;  %v1543_v26 = vcombine.high %v1513_v17, %v5527_v48  ;;  %v5604_v29 = vrot.slane %v1513_v17, %v5529_v55 }
 0x2a0   : > { %v1474_v27 = vshrl.u32 %v1402_v20, 16  ;;  %v1482_v28 = vshrl.u32 %v1403_v21, 16  ;;  %v962_v30 = vpack.i.b16 %v5560_v36, %v945_v18  ;;  %v5608_v33 = vrot.slane %v1741_v24, %v5529_v55 }
 0x2a1   : > { %v1452_v31 = vcombine.low %v1443_v14, %v1451_v62  ;;  %v1453_v32 = vcombine.high %v1443_v14, %v1451_v62  ;;  %v5612_v34 = vpack.i.b16 %v1516_v25, %v1515_v2  ;;  %v5617_v37 = vrot.slane %v1543_v26, %v5529_v55 }
 0x2a2   : > { %v964_v40 = vshrl.u32 %v945_v18, 16  ;;  %v1005_v41 = vcombine.high %v962_v30, %v5527_v48  ;;  %v1012_v42 = vrot.slane %v962_v30, %v5529_v55  ;;  %v1523_v47 = vshrl.u32 %v5614_v35, 16 }
 0x2a3   : > { %v1472_v36 = vpack.i.b16 %v1452_v31, %v1402_v20  ;;  %v1475_v43 = vshrl.u32 %v1452_v31, 16  ;;  %v1480_v44 = vpack.i.b16 %v1453_v32, %v1403_v21  ;;  %v1483_v45 = vshrl.u32 %v1453_v32, 16 }
 0x2a4   : > { %v1609_v46 = vcombine.high %v5612_v34, %v5527_v48  ;;  %v966_v39 = vpack.i.b16 %v965_v16, %v964_v40  ;;  %v1019_v2 = vrot.slane %v1005_v41, %v5529_v55  ;;  %v1020_v53 = vcombine.low %v5546_v19, %v1012_v42 }
 0x2a5   : > { %v1476_v50 = vpack.i.b16 %v1475_v43, %v1474_v27  ;;  %v1484_v51 = vpack.i.b16 %v1483_v45, %v1482_v28  ;;  %1488 = vst.msk [vmem:[#allocation2 + $0x8] sm:$0xff] %vm1486_vm0, %v1472_v36  ;;  %1492 = vst.msk [vmem:[#allocation2 + $0x28] sm:$0xff] %vm1486_vm0, %v1480_v44  ;;  %v1021_v54 = vcombine.high %v5546_v19, %v1012_v42  ;;  %v1540_v6 = vshrl.u32 %v1510_v49, 16 }
 0x2a6   : > { %v5631_v56 = vrot.slane %v5612_v34, %v5529_v55  ;;  %v1036_v59 = vcombine.low %v5551_v22, %v1019_v2  ;;  %v1037_v60 = vcombine.high %v5551_v22, %v1019_v2  ;;  %v1071_v61 = vcombine.high %v966_v39, %v5527_v48 }
 0x2a7   : > { %1490 = vst.msk [vmem:[#allocation2 + $0x18] sm:$0xff] %vm1486_vm0, %v1476_v50  ;;  %1494 = vst.msk [vmem:[#allocation2 + $0x38] sm:$0xff] %vm1486_vm0, %v1484_v51  ;;  %v1028_v63 = vrot.slane %v1020_v53, %v5532_v58  ;;  %v1035_v0 = vrot.slane %v1021_v54, %v5532_v58  ;;  %v1078_v19 = vrot.slane %v966_v39, %v5529_v55 }
 0x2a8   : > { %v1537_v3 = vpack.i.b16 %v1510_v49, %v5568_v52  ;;  %v1044_v4 = vrot.slane %v1036_v59, %v5532_v58  ;;  %v1051_v5 = vrot.slane %v1037_v60, %v5532_v58  ;;  %v1085_v22 = vrot.slane %v1071_v61, %v5529_v55 }
 0x2a9   : > { %v1086_v7 = vcombine.low %v5573_v57, %v1078_v19  ;;  %v1087_v8 = vcombine.high %v5573_v57, %v1078_v19  ;;  %v1254_v9 = vcombine.low %v1028_v63, %v1035_v0  ;;  %v4016_v10 = vcombine.high %v1028_v63, %v1035_v0  ;;  %v1508_v19 = vpop.permute.xlu0 %1507 }
 0x2aa   : > { %v1102_v11 = vcombine.low %v5578_v1, %v1085_v22  ;;  %v1103_v14 = vcombine.high %v5578_v1, %v1085_v22  ;;  %v1270_v15 = vcombine.low %v1044_v4, %v1051_v5  ;;  %v4017_v16 = vcombine.high %v1044_v4, %v1051_v5 }
 0x2ab   : > { %v1094_v17 = vrot.slane %v1086_v7, %v5532_v58  ;;  %v1101_v18 = vrot.slane %v1087_v8, %v5532_v58  ;;  %v1261_v20 = vrot.slane %v1254_v9, %v5529_v55  ;;  %v1269_v21 = vrot.slane %v4016_v10, %v5529_v55 }
 0x2ac   : > { %v1110_v24 = vrot.slane %v1102_v11, %v5532_v58  ;;  %v1117_v57 = vrot.slane %v1103_v14, %v5532_v58  ;;  %v1277_v62 = vrot.slane %v1270_v15, %v5529_v55  ;;  %v1285_v25 = vrot.slane %v4017_v16, %v5529_v55 }
 0x2ad   : > { %v1286_v26 = vcombine.low %v1261_v20, %v1269_v21  ;;  %v1304_v1 = vcombine.low %v1094_v17, %v1101_v18  ;;  %v4018_v27 = vcombine.high %v1094_v17, %v1101_v18  ;;  %v1541_v28 = vpack.i.b16 %v1540_v6, %v1539_v38 }
 0x2ae   : > { %v1294_v30 = vcombine.low %v1277_v62, %v1285_v25  ;;  %v1320_v31 = vcombine.low %v1110_v24, %v1117_v57  ;;  %v4019_v32 = vcombine.high %v1110_v24, %v1117_v57  ;;  %v1690_v40 = vcombine.high %v1537_v3, %v5527_v48 }
 0x2af   : > { %v1293_v41 = vrot.slane %v1286_v26, %v5532_v58  ;;  %v1311_v42 = vrot.slane %v1304_v1, %v5529_v55  ;;  %v1319_v36 = vrot.slane %v4018_v27, %v5529_v55  ;;  %v1697_v43 = vrot.slane %v1537_v3, %v5529_v55 }
 0x2b0   : > { %v1301_v44 = vrot.slane %v1294_v30, %v5532_v58  ;;  %v1327_v45 = vrot.slane %v1320_v31, %v5529_v55  ;;  %v1335_v52 = vrot.slane %v4019_v32, %v5529_v55  ;;  %v1704_v38 = vrot.slane %v1690_v40, %v5529_v55 }
 0x2b1   : > { %v1336_v39 = vcombine.low %v1311_v42, %v1319_v36  ;;  %v1705_v2 = vcombine.low %v5588_v12, %v1697_v43  ;;  %v1706_v49 = vcombine.high %v5588_v12, %v1697_v43  ;;  %v1756_v50 = vcombine.high %v1541_v28, %v5527_v48 }
 0x2b2   : > { %v1302_v51 = vcombine.low %v1293_v41, %v1301_v44  ;;  %v1303_v53 = vcombine.high %v1293_v41, %v1301_v44  ;;  %v1344_v54 = vcombine.low %v1327_v45, %v1335_v52  ;;  %v1721_v59 = vcombine.low %v5591_v13, %v1704_v38 }
 0x2b3   : > { %v1343_v60 = vrot.slane %v1336_v39, %v5532_v58  ;;  %v1713_v61 = vrot.slane %v1705_v2, %v5532_v58  ;;  %v1720_v63 = vrot.slane %v1706_v49, %v5532_v58  ;;  %v1722_v0 = vcombine.high %v5591_v13, %v1704_v38 }
 0x2b4   : > { %v1351_v3 = vrot.slane %v1344_v54, %v5532_v58  ;;  %v1458_v4 = vshrl.u32 %v1302_v51, 16  ;;  %v1466_v12 = vshrl.u32 %v1303_v53, 16  ;;  %v1729_v5 = vrot.slane %v1721_v59, %v5532_v58 }
 0x2b5   : > { %v1736_v22 = vrot.slane %v1722_v0, %v5532_v58  ;;  %v1763_v6 = vrot.slane %v1541_v28, %v5529_v55  ;;  %v1770_v7 = vrot.slane %v1756_v50, %v5529_v55  ;;  %v1907_v8 = vcombine.low %v1713_v61, %v1720_v63 }
 0x2b6   : > { %v1352_v9 = vcombine.low %v1343_v60, %v1351_v3  ;;  %v1353_v10 = vcombine.high %v1343_v60, %v1351_v3  ;;  %v4028_v11 = vcombine.high %v1713_v61, %v1720_v63  ;;  %v1521_v14 = vpack.i.b16 %v1508_v19, %v5614_v35 }
 0x2b7   : > { %v1771_v13 = vcombine.low %v5600_v23, %v1763_v6  ;;  %v1772_v15 = vcombine.high %v5600_v23, %v1763_v6  ;;  %v1787_v16 = vcombine.low %v5608_v33, %v1770_v7  ;;  %v1788_v17 = vcombine.high %v5608_v33, %v1770_v7 }
 0x2b8   : > { %v1456_v18 = vpack.i.b16 %v1352_v9, %v1302_v51  ;;  %v1459_v20 = vshrl.u32 %v1352_v9, 16  ;;  %v1464_v21 = vpack.i.b16 %v1353_v10, %v1303_v53  ;;  %v1467_v24 = vshrl.u32 %v1353_v10, 16 }
 0x2b9   : > { %v1779_v57 = vrot.slane %v1771_v13, %v5532_v58  ;;  %v1786_v62 = vrot.slane %v1772_v15, %v5532_v58  ;;  %v1795_v25 = vrot.slane %v1787_v16, %v5532_v58  ;;  %v1802_v26 = vrot.slane %v1788_v17, %v5532_v58 }
 0x2ba   : > { %v1460_v1 = vpack.i.b16 %v1459_v20, %v1458_v4  ;;  %v1468_v27 = vpack.i.b16 %v1467_v24, %v1466_v12  ;;  %1487 = vst.msk [vmem:[#allocation2] sm:$0xff] %vm1486_vm0, %v1456_v18  ;;  %1491 = vst.msk [vmem:[#allocation2 + $0x20] sm:$0xff] %vm1486_vm0, %v1464_v21  ;;  %v1914_v23 = vrot.slane %v1907_v8, %v5529_v55  ;;  %v1524_v36 = vshrl.u32 %v1508_v19, 16 }
 0x2bb   : > { %v1922_v33 = vrot.slane %v4028_v11, %v5529_v55  ;;  %v1923_v28 = vcombine.low %v1729_v5, %v1736_v22  ;;  %v4029_v30 = vcombine.high %v1729_v5, %v1736_v22  ;;  %v1957_v31 = vcombine.low %v1779_v57, %v1786_v62 }
 0x2bc   : > { %v4030_v32 = vcombine.high %v1779_v57, %v1786_v62  ;;  %1489 = vst.msk [vmem:[#allocation2 + $0x10] sm:$0xff] %vm1486_vm0, %v1460_v1  ;;  %1493 = vst.msk [vmem:[#allocation2 + $0x30] sm:$0xff] %vm1486_vm0, %v1468_v27  ;;  %v1973_v41 = vcombine.low %v1795_v25, %v1802_v26  ;;  %v4031_v42 = vcombine.high %v1795_v25, %v1802_v26 }
 0x2bd   : > { %v1939_v40 = vcombine.low %v1914_v23, %v1922_v33  ;;  %v1930_v43 = vrot.slane %v1923_v28, %v5529_v55  ;;  %v1938_v44 = vrot.slane %v4029_v30, %v5529_v55  ;;  %v1964_v45 = vrot.slane %v1957_v31, %v5529_v55 }
 0x2be   : > { %v1972_v52 = vrot.slane %v4030_v32, %v5529_v55  ;;  %v1623_v38 = vrot.slane %v1609_v46, %v5529_v55  ;;  %v1980_v39 = vrot.slane %v1973_v41, %v5529_v55  ;;  %v1988_v2 = vrot.slane %v4031_v42, %v5529_v55 }
 0x2bf   : > { %v1525_v49 = vpack.i.b16 %v1524_v36, %v1523_v47  ;;  %v1947_v50 = vcombine.low %v1930_v43, %v1938_v44  ;;  %v1558_v53 = vcombine.high %v1521_v14, %v5527_v48  ;;  %v1565_v54 = vrot.slane %v1521_v14, %v5529_v55 }
 0x2c0   : > { %v1989_v51 = vcombine.low %v1964_v45, %v1972_v52  ;;  %v1946_v59 = vrot.slane %v1939_v40, %v5532_v58  ;;  %v1997_v60 = vcombine.low %v1980_v39, %v1988_v2 }
 0x2c1   : > { %v1624_v61 = vcombine.high %v1525_v49, %v5527_v48  ;;  %v1631_v34 = vrot.slane %v1525_v49, %v5529_v55  ;;  %v1954_v46 = vrot.slane %v1947_v50, %v5532_v58  ;;  %v1572_v35 = vrot.slane %v1558_v53, %v5529_v55 }
 0x2c2   : > { %v1996_v63 = vrot.slane %v1989_v51, %v5532_v58  ;;  %v1573_v47 = vcombine.low %v5604_v29, %v1565_v54  ;;  %v2004_v0 = vrot.slane %v1997_v60, %v5532_v58  ;;  %v1574_v19 = vcombine.high %v5604_v29, %v1565_v54 }
 0x2c3   : > { %v1638_v3 = vrot.slane %v1624_v61, %v5529_v55  ;;  %v1639_v4 = vcombine.low %v5631_v56, %v1631_v34  ;;  %v1955_v12 = vcombine.low %v1946_v59, %v1954_v46  ;;  %v1956_v48 = vcombine.high %v1946_v59, %v1954_v46 }
 0x2c4   : > { %v1581_v5 = vrot.slane %v1573_v47, %v5532_v58  ;;  %v1589_v22 = vcombine.low %v5617_v37, %v1572_v35  ;;  %v2005_v6 = vcombine.low %v1996_v63, %v2004_v0  ;;  %v2006_v7 = vcombine.high %v1996_v63, %v2004_v0 }
 0x2c5   : > { %v1588_v8 = vrot.slane %v1574_v19, %v5532_v58  ;;  %v1590_v9 = vcombine.high %v5617_v37, %v1572_v35  ;;  %v2027_v10 = vshrl.u32 %v1955_v12, 16  ;;  %v2035_v11 = vshrl.u32 %v1956_v48, 16 }
 0x2c6   : > { %v1597_v29 = vrot.slane %v1589_v22, %v5532_v58  ;;  %v1640_v14 = vcombine.high %v5631_v56, %v1631_v34  ;;  %v2025_v13 = vpack.i.b16 %v2005_v6, %v1955_v12  ;;  %v2028_v15 = vshrl.u32 %v2005_v6, 16 }
 0x2c7   : > { %v2033_v16 = vpack.i.b16 %v2006_v7, %v1956_v48  ;;  %v2036_v17 = vshrl.u32 %v2006_v7, 16  ;;  %v1604_v18 = vrot.slane %v1590_v9, %v5532_v58  ;;  %v1647_v20 = vrot.slane %v1639_v4, %v5532_v58 }
 0x2c8   : > { %v1654_v21 = vrot.slane %v1640_v14, %v5532_v58  ;;  %v1655_v24 = vcombine.low %v1623_v38, %v1638_v3  ;;  %v2029_v57 = vpack.i.b16 %v2028_v15, %v2027_v10  ;;  %2040 = vst.msk [vmem:[#allocation3 + $0x8] sm:$0xff] %vm1486_vm0, %v2025_v13  ;;  %v1656_v37 = vcombine.high %v1623_v38, %v1638_v3 }
 0x2c9   : > { %v2037_v62 = vpack.i.b16 %v2036_v17, %v2035_v11  ;;  %2044 = vst.msk [vmem:[#allocation3 + $0x28] sm:$0xff] %vm1486_vm0, %v2033_v16  ;;  %v1807_v25 = vcombine.low %v1581_v5, %v1588_v8  ;;  %v4024_v26 = vcombine.high %v1581_v5, %v1588_v8  ;;  %v1823_v1 = vcombine.low %v1597_v29, %v1604_v18 }
 0x2ca   : > { %v1663_v56 = vrot.slane %v1655_v24, %v5532_v58  ;;  %v4025_v27 = vcombine.high %v1597_v29, %v1604_v18  ;;  %2042 = vst.msk [vmem:[#allocation3 + $0x18] sm:$0xff] %vm1486_vm0, %v2029_v57  ;;  %v1670_v23 = vrot.slane %v1656_v37, %v5532_v58  ;;  %v1857_v28 = vcombine.low %v1647_v20, %v1654_v21 }
 0x2cb   : > { %2046 = vst.msk [vmem:[#allocation3 + $0x38] sm:$0xff] %vm1486_vm0, %v2037_v62  ;;  %v1814_v33 = vrot.slane %v1807_v25, %v5529_v55  ;;  %v4026_v30 = vcombine.high %v1647_v20, %v1654_v21  ;;  %v1822_v31 = vrot.slane %v4024_v26, %v5529_v55  ;;  %v1830_v32 = vrot.slane %v1823_v1, %v5529_v55 }
 0x2cc   : > { %v1838_v40 = vrot.slane %v4025_v27, %v5529_v55  ;;  %v1864_v41 = vrot.slane %v1857_v28, %v5529_v55  ;;  %v1873_v36 = vcombine.low %v1663_v56, %v1670_v23  ;;  %v4027_v43 = vcombine.high %v1663_v56, %v1670_v23 }
 0x2cd   : > { %v1872_v42 = vrot.slane %v4026_v30, %v5529_v55  ;;  %v1839_v44 = vcombine.low %v1814_v33, %v1822_v31 }
 0x2ce   : > { %v1847_v45 = vcombine.low %v1830_v32, %v1838_v40  ;;  %v1880_v52 = vrot.slane %v1873_v36, %v5529_v55  ;;  %v1888_v38 = vrot.slane %v4027_v43, %v5529_v55 }
 0x2cf   : > { %v1889_v39 = vcombine.low %v1864_v41, %v1872_v42  ;;  %v1846_v2 = vrot.slane %v1839_v44, %v5532_v58 }
 0x2d0   : > { %v1854_v49 = vrot.slane %v1847_v45, %v5532_v58  ;;  %v1897_v50 = vcombine.low %v1880_v52, %v1888_v38 }
 0x2d1   : > { %v1896_v54 = vrot.slane %v1889_v39, %v5532_v58 }
 0x2d2   : > { %v1855_v51 = vcombine.low %v1846_v2, %v1854_v49  ;;  %v1856_v53 = vcombine.high %v1846_v2, %v1854_v49  ;;  %v1904_v59 = vrot.slane %v1897_v50, %v5532_v58 }
 0x2d4   : > { %v1905_v60 = vcombine.low %v1896_v54, %v1904_v59  ;;  %v1906_v61 = vcombine.high %v1896_v54, %v1904_v59  ;;  %v2011_v34 = vshrl.u32 %v1855_v51, 16  ;;  %v2019_v46 = vshrl.u32 %v1856_v53, 16 }
 0x2d6   : > { %v2009_v63 = vpack.i.b16 %v1905_v60, %v1855_v51  ;;  %v2012_v35 = vshrl.u32 %v1905_v60, 16  ;;  %v2017_v47 = vpack.i.b16 %v1906_v61, %v1856_v53  ;;  %v2020_v55 = vshrl.u32 %v1906_v61, 16 }
 0x2d8   : > { %v2013_v0 = vpack.i.b16 %v2012_v35, %v2011_v34  ;;  %v2021_v19 = vpack.i.b16 %v2020_v55, %v2019_v46  ;;  %2039 = vst.msk [vmem:[#allocation3] sm:$0xff] %vm1486_vm0, %v2009_v63  ;;  %2043 = vst.msk [vmem:[#allocation3 + $0x20] sm:$0xff] %vm1486_vm0, %v2017_v47 }
 0x2da   : > { %2041 = vst.msk [vmem:[#allocation3 + $0x10] sm:$0xff] %vm1486_vm0, %v2013_v0  ;;  %2045 = vst.msk [vmem:[#allocation3 + $0x30] sm:$0xff] %vm1486_vm0, %v2021_v19 }
 0x2db PF: > { %v4568_v58 = vld [vmem:[#allocation9] sm:$0xff]   ;;  %s6191_s13 = sld [smem:[#allocation26_spill]]  ;;  %v5030_v3 = vmov 0.0   ;;  %v4569_v4 = vld [vmem:[#allocation9 + $0x8] sm:$0xff]   ;;  %vm5031_vm1 = vmmov 0   ;;  %v4570_v12 = vld [vmem:[#allocation9 + $0x10] sm:$0xff]   ;;  %v2210_v25 = vlaneseq }
 0x2dc   : > { %4248 = vmatprep.subr.bf16.mxu0 %v5030_v3  ;;  %4268 = vmatprep.subr.bf16.mxu1 %v5030_v3  ;;  %v4571_v48 = vld [vmem:[#allocation9 + $0x18] sm:$0xff]   ;;  %v4572_v5 = vld [vmem:[#allocation9 + $0x20] sm:$0xff]   ;;  %v4573_v22 = vld [vmem:[#allocation9 + $0x28] sm:$0xff]   ;;  %vm2458_vm2 = vcmask 261120   ;;  %s5032_s19 = smov 32   ;;  %s5033_s20 = smov 96  }
 0x2dd   : > { %4249 = vmatpush3.bf16.msra.mxu0 %v4568_v58  ;;  %4264 = vmatprep.mubr.msk.bf16.mxu0 %vm5031_vm1, %v5030_v3  ;;  %v4574_v6 = vld [vmem:[#allocation9 + $0x30] sm:$0xff]   ;;  %v4575_v7 = vld [vmem:[#allocation9 + $0x38] sm:$0xff]   ;;  %v2450_v20 = vld [vmem:[#allocation2] sm:$0xff]  ;;  %s6139_s9 = smov 64   ;;  %v5035_v62 = vmov 1983009808  }
 0x2de   : > { %4250 = vmatprep.subr.bf16.mxu0 %v5030_v3  ;;  %4272 = vmatprep.mubr.msk.bf16.mxu1 %vm5031_vm1, %v5030_v3  ;;  %v2463_v21 = vsel %vm2458_vm2, %v2450_v20, 0  ;;  %v2451_v24 = vld [vmem:[#allocation2 + $0x8] sm:$0xff]  ;;  %v2208_v37 = vunpack.c.l.s4 %v5035_v62  ;;  %v5786_v26 = vshrl.u32 %v2210_v25, 7  ;;  %v5036_v1 = vmov 1934713408   ;;  %s6196_s17 = sld [smem:[#allocation40_spill]] }
 0x2df   : > { %4269 = vmatpush3.bf16.xpose.msra.mxu1 %v2463_v21  ;;  %v2466_v57 = vsel %vm2458_vm2, %v2451_v24, 0  ;;  %v2239_v27 = vunpack.c.l.s4 %v5036_v1  ;;  %v5037_v33 = vmov 0   ;;  %vm3247_vm4 = vcmask 523264   ;;  %s6199_s8 = sld [smem:[#allocation43_spill]]  ;;  %p6204_p9 = scmp.ne.s32.totalorder %s6180_s15, 0 }
 0x2e0   : > { %4270 = vmatprep.subr.bf16.mxu1 %v5030_v3  ;;  %v2209_v56 = vunpack.c.0.s8 %v2208_v37  ;;  %v2201_v28 = vpack.i.b16 %v5037_v33, %v5037_v33  ;;  %vm3250_vm5 = vcmask 785408  }
 0x2e1   : > { %4251 = vmatpush3.bf16.msra.mxu0 %v4569_v4  ;;  %s4032_s1 = sshll.u32 %s6191_s13, 4  ;;  %v2240_v41 = vunpack.c.0.s8 %v2239_v27 }
 0x2e2   : > { %4252 = vmatprep.subr.bf16.mxu0 %v5030_v3  ;;  %s2048_s24 = sshra.s32 %s4032_s1, 3  ;;  %v5791_v40 = vsub.s32 %v2209_v56, %v5786_v26 }
 0x2e3   : > { %s4033_s21 = sshll.u32 %s2048_s24, 2  ;;  %v5794_v39 = vsub.s32 %v2240_v41, %v5786_v26  ;;  %s6198_s24 = sld [smem:[#allocation42_spill]] }
 0x2e4   : > { %s2051_s16 = scalar_lea.vmem %s5481_s6, %s4033_s21 [#allocation6]  ;;  %s6192_s6 = sld [smem:[#allocation33_spill]] }
 0x2e5   : > { %4253 = vmatpush3.bf16.msra.mxu0 %v4570_v12  ;;  %v5768_v8 = vld [vmem:[%s2051_s16] sm:$0xff]   ;;  %s6195_s21 = sld [smem:[#allocation39_spill]]  ;;  %s6202_s16 = sld [smem:[#allocation45_spill]] }
 0x2e6   : > { %4254 = vmatprep.subr.bf16.mxu0 %v5030_v3 }
 0x2e7   : > { %4271 = vmatpush3.bf16.xpose.msra.mxu1 %v2466_v57 }
 0x2e8   : > { %4276 = vmatprep.subr.bf16.mxu1 %v5030_v3 }
 0x2e9   : > { %4255 = vmatpush3.bf16.msra.mxu0 %v4571_v48 }
 0x2ea   : > { %4256 = vmatprep.subr.bf16.mxu0 %v5030_v3  ;;  %v4034_v9 = vld [vmem:[%s6192_s6] ss:$0 sm:$0xff]  ;;  %s3827_s6 = sshll.u32 %s672_s5, 4  ;;  %s6035_s6 = int_to_ptr.vmem [resolvable:$true] %s3827_s6 }
 0x2ed   : > { %4257 = vmatpush3.bf16.msra.mxu0 %v4572_v5 }
 0x2ee   : > { %4258 = vmatprep.subr.bf16.mxu0 %v5030_v3 }
 0x2f1   : > { %4259 = vmatpush3.bf16.msra.mxu0 %v4573_v22 }
 0x2f2   : > { %4260 = vmatprep.subr.bf16.mxu0 %v5030_v3 }
 0x2f5   : > { %4261 = vmatpush3.bf16.msra.mxu0 %v4574_v6 }
 0x2f6   : > { %4262 = vmatprep.subr.bf16.mxu0 %v5030_v3 }
 0x2f9   : > { %4263 = vmatpush3.bf16.msra.mxu0 %v4575_v7 }
 0x2fa   : > { %4300 = vmatprep.subr.bf16.mxu0 %v5030_v3 }
 0x2fc   : > { %4265 = vmatmul.mubr.bf16.vlgmr.msra.gmra.mrb[0].mxu0 %v5768_v8 }
 0x2fd   : > { %4304 = vmatprep.mubr.msk.bf16.mxu0 %vm5031_vm1, %v5030_v3 }
 0x3cf   : > { %v2167_v10 = vpop.f32.mrb[0].mxu0 }
 0x3d0   : > { %v2168_v11 = vadd.f32 %v4034_v9, %v2167_v10  ;;  %v4266_v29 = vpop.f32.mrb[1].mxu0 }
 0x3d1   : > { %v2170_v14 = vpop.f32.mrb[2].mxu0 }
 0x3d2   : > { %v2171_v13 = vadd.f32 %v4034_v9, %v2170_v14  ;;  %v4267_v15 = vpop.f32.mrb[3].mxu0  ;;  %v2174_v16 = vmul.f32 0.17677669, %v2168_v11 }
 0x3d4   : > { %v2175_v17 = vmul.f32 0.17677669, %v2171_v13 }
 0x3d6   : > { %v2176_v18 = vpack.c.bf16 %v2175_v17, %v2174_v16 }
 0x3d8   : > { %2182 = vrot.lane.b32.xlu1 %v2176_v18, %s5032_s19  ;;  %2178 = vrot.lane.b32.xlu0 %v2176_v18, %s5033_s20  ;;  %v2188_v32 = vshrl.u32 %v2176_v18, 16 }
 0x3dc   : > { %2180 = vrot.lane.b32.xlu0 %v2176_v18, %s6139_s9 }
 0x44a   : > { %v2179_v23 = vpop.permute.xlu0 %2178  ;;  %v2183_v42 = vpop.permute.xlu1 %2182 }
 0x44b   : > { %v2186_v30 = vpack.i.b16 %v2179_v23, %v2176_v18  ;;  %v2189_v31 = vshrl.u32 %v2179_v23, 16  ;;  %v2197_v52 = vshrl.u32 %v2183_v42, 16 }
 0x44d   : > { %v2190_v36 = vpack.i.b16 %v2189_v31, %v2188_v32  ;;  %v2206_v44 = vcombine.high %v2186_v30, %v2201_v28  ;;  %v2213_v2 = vrot.slane %v2186_v30, %v5791_v40 }
 0x44e   : > { %v2181_v43 = vpop.permute.xlu0 %2180 }
 0x44f   : > { %v2194_v45 = vpack.i.b16 %v2183_v42, %v2181_v43  ;;  %v2196_v38 = vshrl.u32 %v2181_v43, 16  ;;  %v2272_v51 = vcombine.high %v2190_v36, %v2201_v28  ;;  %v2220_v54 = vrot.slane %v2206_v44, %v5791_v40  ;;  %v2452_v43 = vld [vmem:[#allocation2 + $0x10] sm:$0xff] }
 0x450   : > { %v2279_v34 = vrot.slane %v2190_v36, %v5791_v40 }
 0x451   : > { %v2221_v49 = vcombine.high %v2194_v45, %v2201_v28  ;;  %v2228_v50 = vrot.slane %v2194_v45, %v5791_v40  ;;  %v2198_v53 = vpack.i.b16 %v2197_v52, %v2196_v38  ;;  %v2286_v19 = vrot.slane %v2272_v51, %v5791_v40  ;;  %v2454_v51 = vld [vmem:[#allocation2 + $0x20] sm:$0xff] }
 0x452   : > { %v2513_v38 = vsel %vm2458_vm2, %v2452_v43, 0 }
 0x453   : > { %v2235_v59 = vrot.slane %v2221_v49, %v5791_v40  ;;  %v2236_v60 = vcombine.low %v2213_v2, %v2228_v50  ;;  %v2237_v61 = vcombine.high %v2213_v2, %v2228_v50  ;;  %v2287_v46 = vcombine.high %v2198_v53, %v2201_v28  ;;  %v2453_v2 = vld [vmem:[#allocation2 + $0x18] sm:$0xff] }
 0x454   : > { %v2294_v63 = vrot.slane %v2198_v53, %v5791_v40  ;;  %v2516_v49 = vsel %vm2458_vm2, %v2453_v2, 0 }
 0x455   : > { %v2244_v35 = vrot.slane %v2236_v60, %v5794_v39  ;;  %v2251_v47 = vrot.slane %v2237_v61, %v5794_v39  ;;  %v2252_v55 = vcombine.low %v2220_v54, %v2235_v59  ;;  %v2253_v0 = vcombine.high %v2220_v54, %v2235_v59  ;;  %v2455_v60 = vld [vmem:[#allocation2 + $0x28] sm:$0xff] }
 0x456   : > { %v2301_v58 = vrot.slane %v2287_v46, %v5791_v40  ;;  %v2302_v4 = vcombine.low %v2279_v34, %v2294_v63  ;;  %v2303_v12 = vcombine.high %v2279_v34, %v2294_v63  ;;  %v2563_v59 = vsel %vm2458_vm2, %v2454_v51, 0  ;;  %v2456_v46 = vld [vmem:[#allocation2 + $0x30] sm:$0xff] }
 0x457   : > { %v2260_v48 = vrot.slane %v2252_v55, %v5794_v39  ;;  %v2267_v5 = vrot.slane %v2253_v0, %v5794_v39  ;;  %v2338_v22 = vcombine.low %v2244_v35, %v2251_v47  ;;  %v4044_v6 = vcombine.high %v2244_v35, %v2251_v47  ;;  %v2457_v55 = vld [vmem:[#allocation2 + $0x38] sm:$0xff] }
 0x458   : > { %v2310_v7 = vrot.slane %v2302_v4, %v5794_v39  ;;  %v2317_v9 = vrot.slane %v2303_v12, %v5794_v39  ;;  %v2318_v10 = vcombine.low %v2286_v19, %v2301_v58  ;;  %v2319_v11 = vcombine.high %v2286_v19, %v2301_v58 }
 0x459   : > { %v2345_v29 = vrot.slane %v2338_v22, %v5791_v40  ;;  %v2353_v14 = vrot.slane %v4044_v6, %v5791_v40  ;;  %v2354_v13 = vcombine.low %v2260_v48, %v2267_v5  ;;  %v4045_v15 = vcombine.high %v2260_v48, %v2267_v5 }
 0x45a   : > { %v2326_v16 = vrot.slane %v2318_v10, %v5794_v39  ;;  %v2333_v17 = vrot.slane %v2319_v11, %v5794_v39  ;;  %v2388_v18 = vcombine.low %v2310_v7, %v2317_v9  ;;  %v4046_v20 = vcombine.high %v2310_v7, %v2317_v9 }
 0x45b   : > { %v2361_v21 = vrot.slane %v2354_v13, %v5791_v40  ;;  %v2369_v24 = vrot.slane %v4045_v15, %v5791_v40  ;;  %v2370_v27 = vcombine.low %v2345_v29, %v2353_v14  ;;  %v2566_v61 = vsel %vm2458_vm2, %v2455_v60, 0 }
 0x45c   : > { %v2395_v57 = vrot.slane %v2388_v18, %v5791_v40  ;;  %v2403_v62 = vrot.slane %v4046_v20, %v5791_v40  ;;  %v2404_v37 = vcombine.low %v2326_v16, %v2333_v17  ;;  %v4047_v56 = vcombine.high %v2326_v16, %v2333_v17 }
 0x45d   : > { %v2378_v1 = vcombine.low %v2361_v21, %v2369_v24  ;;  %v2377_v41 = vrot.slane %v2370_v27, %v5794_v39  ;;  %v2613_v47 = vsel %vm2458_vm2, %v2456_v46, 0  ;;  %v2616_v0 = vsel %vm2458_vm2, %v2457_v55, 0 }
 0x45e   : > { %v2411_v23 = vrot.slane %v2404_v37, %v5791_v40  ;;  %v2419_v28 = vrot.slane %v4047_v56, %v5791_v40  ;;  %v2420_v30 = vcombine.low %v2395_v57, %v2403_v62  ;;  %v2660_v12 = vand.u32 127, %v2210_v25 }
 0x45f   : > { %v2385_v31 = vrot.slane %v2378_v1, %v5794_v39  ;;  %v5850_v48 = vstv %s5501_s3 }
 0x460   : > { %v2428_v32 = vcombine.low %v2411_v23, %v2419_v28  ;;  %v2427_v42 = vrot.slane %v2420_v30, %v5794_v39  ;;  %vm5853_vm3 = vcmp.ge.s32.totalorder %v2660_v12, %v5850_v48 }
 0x461   : > { %v2386_v44 = vcombine.low %v2377_v41, %v2385_v31  ;;  %v2387_v63 = vcombine.high %v2377_v41, %v2385_v31 }
 0x462   : > { %v2435_v36 = vrot.slane %v2428_v32, %v5794_v39 }
 0x463   : > { %v2441_v53 = vshrl.u32 %v2386_v44, 16  ;;  %v2447_v58 = vshrl.u32 %v2387_v63, 16 }
 0x464   : > { %v2436_v45 = vcombine.low %v2427_v42, %v2435_v36  ;;  %v2437_v34 = vcombine.high %v2427_v42, %v2435_v36 }
 0x466   : > { %v2440_v52 = vpack.i.b16 %v2436_v45, %v2386_v44  ;;  %v2442_v50 = vshrl.u32 %v2436_v45, 16  ;;  %v2446_v35 = vpack.i.b16 %v2437_v34, %v2387_v63  ;;  %v2448_v19 = vshrl.u32 %v2437_v34, 16 }
 0x468   : > { %4273 = vmatmul.mubr.msk.bf16.vlgmr.msra.gmra.mrb[0].mxu1 %vm2458_vm2, %v2440_v52  ;;  %v2443_v54 = vpack.i.b16 %v2442_v50, %v2441_v53  ;;  %v2449_v4 = vpack.i.b16 %v2448_v19, %v2447_v58 }
 0x469   : > { %4277 = vmatpush3.bf16.xpose.msra.mxu1 %v2513_v38  ;;  %4280 = vmatprep.mubr.msk.bf16.mxu1 %vm5031_vm1, %v5030_v3 }
 0x46a   : > { %4278 = vmatprep.subr.bf16.mxu1 %v5030_v3 }
 0x471   : > { %4279 = vmatpush3.bf16.xpose.msra.mxu1 %v2516_v49 }
 0x472   : > { %4284 = vmatprep.subr.bf16.mxu1 %v5030_v3 }
 0x478   : > { %4281 = vmatmul.mubr.msk.bf16.vlgmr.msra.gmra.mrb[4].mxu1 %vm2458_vm2, %v2443_v54 }
 0x479   : > { %4285 = vmatpush3.bf16.xpose.msra.mxu1 %v2563_v59  ;;  %4288 = vmatprep.mubr.msk.bf16.mxu1 %vm5031_vm1, %v5030_v3 }
 0x47a   : > { %4286 = vmatprep.subr.bf16.mxu1 %v5030_v3 }
 0x481   : > { %4287 = vmatpush3.bf16.xpose.msra.mxu1 %v2566_v61 }
 0x482   : > { %4292 = vmatprep.subr.bf16.mxu1 %v5030_v3 }
 0x488   : > { %4289 = vmatmul.mubr.msk.bf16.vlgmr.msra.gmra.mrb[8].mxu1 %vm2458_vm2, %v2446_v35 }
 0x489   : > { %4293 = vmatpush3.bf16.xpose.msra.mxu1 %v2613_v47  ;;  %4296 = vmatprep.mubr.msk.bf16.mxu1 %vm5031_vm1, %v5030_v3 }
 0x48a   : > { %4294 = vmatprep.subr.bf16.mxu1 %v5030_v3 }
 0x491   : > { %4295 = vmatpush3.bf16.xpose.msra.mxu1 %v2616_v0 }
 0x492   : > { %4308 = vmatprep.subr.bf16.mxu1 %v5030_v3 }
 0x498   : > { %4297 = vmatmul.mubr.msk.bf16.vlgmr.msra.gmra.mrb[12].mxu1 %vm2458_vm2, %v2449_v4 }
 0x499   : > { %4312 = vmatprep.mubr.msk.bf16.mxu1 %vm5031_vm1, %v5030_v3 }
 0x53b   : > { %v2502_v22 = vpop.f32.mrb[0].mxu1 }
 0x53c   : > { %v2665_v6 = vsel %vm5853_vm3, -1e+09, %v2502_v22  ;;  %v4274_v7 = vpop.f32.mrb[1].mxu1 }
 0x53d   : > { %v2505_v9 = vpop.f32.mrb[2].mxu1  ;;  %v2673_v10 = vsel %vm2458_vm2, %v2665_v6, -inf  ;;  %v2766_v7 = vld [vmem:[#allocation3 + $0x8] sm:$0xff] }
 0x53e   : > { %v2666_v11 = vsel %vm5853_vm3, -1e+09, %v2505_v9  ;;  %2674 = vmax.xlane.f32.xlu1 %v2673_v10  ;;  %v4275_v25 = vpop.f32.mrb[3].mxu1 }
 0x53f   : > { %v2676_v29 = vsel %vm2458_vm2, %v2666_v11, -inf }
 0x540   : > { %2677 = vmax.xlane.f32.xlu0 %v2676_v29 }
 0x54b   : > { %v2552_v14 = vpop.f32.mrb[4].mxu1 }
 0x54c   : > { %v2667_v13 = vsel %vm5853_vm3, -1e+09, %v2552_v14  ;;  %v4282_v15 = vpop.f32.mrb[5].mxu1 }
 0x54d   : > { %v2555_v16 = vpop.f32.mrb[6].mxu1  ;;  %v2679_v17 = vsel %vm2458_vm2, %v2667_v13, -inf }
 0x54e   : > { %v2668_v18 = vsel %vm5853_vm3, -1e+09, %v2555_v16  ;;  %2680 = vmax.xlane.f32.xlu0 %v2679_v17  ;;  %v4283_v20 = vpop.f32.mrb[7].mxu1 }
 0x54f   : > { %v2682_v21 = vsel %vm2458_vm2, %v2668_v18, -inf  ;;  %v2768_v20 = vld [vmem:[#allocation3 + $0x18] sm:$0xff] }
 0x550   : > { %2683 = vmax.xlane.f32.xlu1 %v2682_v21 }
 0x55b   : > { %v2602_v24 = vpop.f32.mrb[8].mxu1 }
 0x55c   : > { %v2669_v57 = vsel %vm5853_vm3, -1e+09, %v2602_v24  ;;  %v4290_v62 = vpop.f32.mrb[9].mxu1 }
 0x55d   : > { %v2605_v37 = vpop.f32.mrb[10].mxu1  ;;  %v2685_v56 = vsel %vm2458_vm2, %v2669_v57, -inf }
 0x55e   : > { %v2670_v1 = vsel %vm5853_vm3, -1e+09, %v2605_v37  ;;  %2686 = vmax.xlane.f32.xlu0 %v2685_v56  ;;  %v4291_v27 = vpop.f32.mrb[11].mxu1 }
 0x55f   : > { %v2688_v23 = vsel %vm2458_vm2, %v2670_v1, -inf }
 0x560   : > { %2689 = vmax.xlane.f32.xlu1 %v2688_v23 }
 0x56b   : > { %v2652_v28 = vpop.f32.mrb[12].mxu1 }
 0x56c   : > { %v2671_v30 = vsel %vm5853_vm3, -1e+09, %v2652_v28  ;;  %v4298_v31 = vpop.f32.mrb[13].mxu1 }
 0x56d   : > { %v2655_v32 = vpop.f32.mrb[14].mxu1  ;;  %v2691_v41 = vsel %vm2458_vm2, %v2671_v30, -inf }
 0x56e   : > { %v2672_v42 = vsel %vm5853_vm3, -1e+09, %v2655_v32  ;;  %2692 = vmax.xlane.f32.xlu0 %v2691_v41  ;;  %v4299_v36 = vpop.f32.mrb[15].mxu1  ;;  %v2769_v32 = vld [vmem:[#allocation3 + $0x20] sm:$0xff] }
 0x56f   : > { %v2694_v43 = vsel %vm2458_vm2, %v2672_v42, -inf }
 0x570   : > { %2695 = vmax.xlane.f32.xlu1 %v2694_v43 }
 0x5cb   : > { %v2675_v44 = vpop.xlane.xlu1 %2674 }
 0x5cc   : > { %v2697_v45 = vsub.f32 %v2665_v6, %v2675_v44  ;;  %v2765_v6 = vld [vmem:[#allocation3] sm:$0xff] }
 0x5cd   : > { %v2678_v52 = vpop.xlane.xlu0 %2677  ;;  %4301 = vmatpush3.bf16.msra.mxu0 %v2765_v6 }
 0x5ce   : > { %v2705_v38 = vmul.f32 1.442695, %v2697_v45  ;;  %v2698_v2 = vsub.f32 %v2666_v11, %v2678_v52  ;;  %4302 = vmatprep.subr.bf16.mxu0 %v5030_v3 }
 0x5d0   : > { %4626 = vpow2.f32 %v2705_v38  ;;  %v2707_v49 = vmul.f32 1.442695, %v2698_v2  ;;  %v2771_v2 = vld [vmem:[#allocation3 + $0x30] sm:$0xff] }
 0x5d1   : > { %4303 = vmatpush3.bf16.msra.mxu0 %v2766_v7 }
 0x5d2   : > { %4628 = vpow2.f32 %v2707_v49  ;;  %4316 = vmatprep.subr.bf16.mxu0 %v5030_v3 }
 0x5da   : > { %v5881_v50 = vpop.eup %4626 }
 0x5db   : > { %v2681_v51 = vpop.xlane.xlu0 %2680  ;;  %v2721_v53 = vsel %vm2458_vm2, %v5881_v50, 0.0 }
 0x5dc   : > { %v5885_v54 = vpop.eup %4628  ;;  %v2699_v59 = vsub.f32 %v2667_v13, %v2681_v51  ;;  %2722 = vadd.xlane.f32.xlu0 %v2721_v53 }
 0x5dd   : > { %v2684_v60 = vpop.xlane.xlu1 %2683  ;;  %v2724_v61 = vsel %vm2458_vm2, %v5885_v54, 0.0 }
 0x5de   : > { %v2709_v34 = vmul.f32 1.442695, %v2699_v59  ;;  %v2700_v46 = vsub.f32 %v2668_v18, %v2684_v60  ;;  %2725 = vadd.xlane.f32.xlu1 %v2724_v61  ;;  %v2767_v18 = vld [vmem:[#allocation3 + $0x10] sm:$0xff] }
 0x5df   : > { %4309 = vmatpush3.bf16.msra.mxu1 %v2767_v18 }
 0x5e0   : > { %4630 = vpow2.f32 %v2709_v34  ;;  %v2711_v63 = vmul.f32 1.442695, %v2700_v46  ;;  %4310 = vmatprep.subr.bf16.mxu1 %v5030_v3 }
 0x5e2   : > { %4632 = vpow2.f32 %v2711_v63 }
 0x5e3   : > { %4311 = vmatpush3.bf16.msra.mxu1 %v2768_v20 }
 0x5e4   : > { %4324 = vmatprep.subr.bf16.mxu1 %v5030_v3 }
 0x5ea   : > { %v5889_v35 = vpop.eup %4630 }
 0x5eb   : > { %v2687_v47 = vpop.xlane.xlu0 %2686  ;;  %v2727_v55 = vsel %vm2458_vm2, %v5889_v35, 0.0 }
 0x5ec   : > { %v5893_v0 = vpop.eup %4632  ;;  %v2701_v19 = vsub.f32 %v2669_v57, %v2687_v47  ;;  %2728 = vadd.xlane.f32.xlu0 %v2727_v55 }
 0x5ed   : > { %v2690_v58 = vpop.xlane.xlu1 %2689  ;;  %v2730_v4 = vsel %vm2458_vm2, %v5893_v0, 0.0 }
 0x5ee   : > { %v2713_v12 = vmul.f32 1.442695, %v2701_v19  ;;  %v2702_v5 = vsub.f32 %v2670_v1, %v2690_v58  ;;  %2731 = vadd.xlane.f32.xlu1 %v2730_v4  ;;  %v4578_v19 = vld [vmem:[#allocation14 + $0x8] sm:$0xff]   ;;  %v4579_v58 = vld [vmem:[#allocation14 + $0x10] sm:$0xff]   ;;  %v4580_v4 = vld [vmem:[#allocation14 + $0x18] sm:$0xff]  }
 0x5f0   : > { %4634 = vpow2.f32 %v2713_v12  ;;  %v2715_v22 = vmul.f32 1.442695, %v2702_v5  ;;  %v4581_v12 = vld [vmem:[#allocation14 + $0x20] sm:$0xff]   ;;  %v4582_v5 = vld [vmem:[#allocation14 + $0x28] sm:$0xff]  }
 0x5f2   : > { %4636 = vpow2.f32 %v2715_v22 }
 0x5fa   : > { %v5898_v9 = vpop.eup %4634 }
 0x5fb   : > { %v2693_v10 = vpop.xlane.xlu0 %2692  ;;  %v2733_v11 = vsel %vm2458_vm2, %v5898_v9, 0.0 }
 0x5fc   : > { %v5903_v25 = vpop.eup %4636  ;;  %v2703_v29 = vsub.f32 %v2671_v30, %v2693_v10  ;;  %2734 = vadd.xlane.f32.xlu0 %v2733_v11 }
 0x5fd   : > { %v2696_v14 = vpop.xlane.xlu1 %2695  ;;  %v2736_v13 = vsel %vm2458_vm2, %v5903_v25, 0.0 }
 0x5fe   : > { %v2717_v15 = vmul.f32 1.442695, %v2703_v29  ;;  %v2704_v16 = vsub.f32 %v2672_v42, %v2696_v14  ;;  %2737 = vadd.xlane.f32.xlu1 %v2736_v13  ;;  %v2770_v42 = vld [vmem:[#allocation3 + $0x28] sm:$0xff] }
 0x600   : > { %4638 = vpow2.f32 %v2717_v15  ;;  %v2719_v17 = vmul.f32 1.442695, %v2704_v16 }
 0x602   : > { %4640 = vpow2.f32 %v2719_v17 }
 0x60a   : > { %v4639_v21 = vpop.eup %4638 }
 0x60b   : > { %v2739_v24 = vsel %vm2458_vm2, %v4639_v21, 0.0 }
 0x60c   : > { %v4641_v57 = vpop.eup %4640  ;;  %2740 = vadd.xlane.f32.xlu0 %v2739_v24 }
 0x60d   : > { %v2742_v62 = vsel %vm2458_vm2, %v4641_v57, 0.0 }
 0x60e   : > { %2743 = vadd.xlane.f32.xlu1 %v2742_v62 }
 0x669   : > { %v2723_v37 = vpop.xlane.xlu0 %2722 }
 0x66a   : > { %4642 = vrcp.f32 %v2723_v37 }
 0x66b   : > { %v2726_v56 = vpop.xlane.xlu1 %2725 }
 0x66c   : > { %4644 = vrcp.f32 %v2726_v56 }
 0x674   : > { %v4643_v1 = vpop.eup %4642 }
 0x675   : > { %v2753_v23 = vmul.f32 %v4643_v1, %v5881_v50  ;;  %v2772_v50 = vld [vmem:[#allocation3 + $0x38] sm:$0xff] }
 0x676   : > { %v4645_v27 = vpop.eup %4644 }
 0x677   : > { %v2754_v28 = vmul.f32 %v4645_v27, %v5885_v54 }
 0x679   : > { %v2729_v30 = vpop.xlane.xlu0 %2728  ;;  %v2761_v31 = vpack.c.bf16 %v2754_v28, %v2753_v23 }
 0x67a   : > { %4646 = vrcp.f32 %v2729_v30 }
 0x67b   : > { %v2732_v41 = vpop.xlane.xlu1 %2731  ;;  %4305 = vmatmul.mubr.msk.bf16.vlgmr.msra.gmra.mrb[4].mxu0 %vm2458_vm2, %v2761_v31 }
 0x67c   : > { %4648 = vrcp.f32 %v2732_v41  ;;  %4317 = vmatpush3.bf16.msra.mxu0 %v2769_v32  ;;  %4320 = vmatprep.mubr.msk.bf16.mxu0 %vm5031_vm1, %v5030_v3 }
 0x67d   : > { %4318 = vmatprep.subr.bf16.mxu0 %v5030_v3 }
 0x680   : > { %4319 = vmatpush3.bf16.msra.mxu0 %v2770_v42 }
 0x681   : > { %4332 = vmatprep.subr.bf16.mxu0 %v5030_v3 }
 0x684   : > { %v4647_v36 = vpop.eup %4646 }
 0x685   : > { %v2755_v44 = vmul.f32 %v4647_v36, %v5889_v35 }
 0x686   : > { %v4649_v43 = vpop.eup %4648 }
 0x687   : > { %v2756_v45 = vmul.f32 %v4649_v43, %v5893_v0  ;;  %v4577_v0 = vld [vmem:[#allocation14] sm:$0xff]  }
 0x689   : > { %v2735_v52 = vpop.xlane.xlu0 %2734  ;;  %v2762_v38 = vpack.c.bf16 %v2756_v45, %v2755_v44 }
 0x68a   : > { %4650 = vrcp.f32 %v2735_v52 }
 0x68b   : > { %4313 = vmatmul.mubr.msk.bf16.vlgmr.msra.gmra.mrb[16].mxu1 %vm2458_vm2, %v2762_v38  ;;  %v2738_v49 = vpop.xlane.xlu1 %2737 }
 0x68c   : > { %4652 = vrcp.f32 %v2738_v49  ;;  %4325 = vmatpush3.bf16.msra.mxu1 %v2771_v2  ;;  %4328 = vmatprep.mubr.msk.bf16.mxu1 %vm5031_vm1, %v5030_v3 }
 0x68d   : > { %4326 = vmatprep.subr.bf16.mxu1 %v5030_v3 }
 0x690   : > { %4327 = vmatpush3.bf16.msra.mxu1 %v2772_v50 }
 0x694   : > { %v4651_v51 = vpop.eup %4650 }
 0x695   : > { %v2757_v54 = vmul.f32 %v4651_v51, %v5898_v9 }
 0x696   : > { %v4653_v53 = vpop.eup %4652 }
 0x697   : > { %v2758_v59 = vmul.f32 %v4653_v53, %v5903_v25 }
 0x699   : > { %v2741_v60 = vpop.xlane.xlu0 %2740  ;;  %v2763_v61 = vpack.c.bf16 %v2758_v59, %v2757_v54 }
 0x69a   : > { %4654 = vrcp.f32 %v2741_v60 }
 0x69b   : > { %4321 = vmatmul.mubr.msk.bf16.vlgmr.msra.gmra.mrb[8].mxu0 %vm2458_vm2, %v2763_v61  ;;  %v2744_v34 = vpop.xlane.xlu1 %2743 }
 0x69c   : > { %4656 = vrcp.f32 %v2744_v34  ;;  %4348 = vmatprep.mubr.msk.bf16.mxu0 %vm5031_vm1, %v5030_v3  ;;  %4333 = vmatpush3.bf16.msra.mxu0 %v4577_v0 }
 0x69d   : > { %4334 = vmatprep.subr.bf16.mxu0 %v5030_v3 }
 0x6a0   : > { %4335 = vmatpush3.bf16.msra.mxu0 %v4578_v19 }
 0x6a1   : > { %4336 = vmatprep.subr.bf16.mxu0 %v5030_v3 }
 0x6a4   : > { %v4655_v46 = vpop.eup %4654  ;;  %4337 = vmatpush3.bf16.msra.mxu0 %v4579_v58 }
 0x6a5   : > { %v2759_v35 = vmul.f32 %v4655_v46, %v4639_v21  ;;  %4338 = vmatprep.subr.bf16.mxu0 %v5030_v3 }
 0x6a6   : > { %v4657_v63 = vpop.eup %4656 }
 0x6a7   : > { %v2760_v47 = vmul.f32 %v4657_v63, %v4641_v57 }
 0x6a8   : > { %4339 = vmatpush3.bf16.msra.mxu0 %v4580_v4 }
 0x6a9   : > { %v2764_v55 = vpack.c.bf16 %v2760_v47, %v2759_v35  ;;  %4340 = vmatprep.subr.bf16.mxu0 %v5030_v3 }
 0x6ab   : > { %4329 = vmatmul.mubr.msk.bf16.vlgmr.msra.gmra.mrb[20].mxu1 %vm2458_vm2, %v2764_v55 }
 0x6ac   : > { %3564 = vmatprep.mubr.bf16.mxu1 %v5037_v33  ;;  %4341 = vmatpush3.bf16.msra.mxu0 %v4581_v12  ;;  %v4583_v12 = vld [vmem:[#allocation14 + $0x30] sm:$0xff]  }
 0x6ad   : > { %4342 = vmatprep.subr.bf16.mxu0 %v5030_v3 }
 0x6b0   : > { %4343 = vmatpush3.bf16.msra.mxu0 %v4582_v5 }
 0x6b1   : > { %4344 = vmatprep.subr.bf16.mxu0 %v5030_v3 }
 0x6b4   : > { %4345 = vmatpush3.bf16.msra.mxu0 %v4583_v12 }
 0x6b5   : > { %4346 = vmatprep.subr.bf16.mxu0 %v5030_v3 }
 0x74e   : > { %v2810_v33 = vpop.f32.mrb[4].mxu0 }
 0x74f   : > { %v4306_v22 = vpop.f32.mrb[5].mxu0 }
 0x750   : > { %v2813_v6 = vpop.f32.mrb[6].mxu0 }
 0x751   : > { %v4307_v7 = vpop.f32.mrb[7].mxu0 }
 0x75e   : > { %v2854_v9 = vpop.f32.mrb[16].mxu1 }
 0x75f   : > { %v4314_v10 = vpop.f32.mrb[17].mxu1 }
 0x760   : > { %v2857_v11 = vpop.f32.mrb[18].mxu1 }
 0x761   : > { %v4315_v25 = vpop.f32.mrb[19].mxu1 }
 0x76e   : > { %v2898_v29 = vpop.f32.mrb[8].mxu0 }
 0x76f   : > { %v2949_v14 = vcombine.low %v2810_v33, %v2898_v29  ;;  %v2950_v13 = vcombine.high %v2810_v33, %v2898_v29  ;;  %v4322_v15 = vpop.f32.mrb[9].mxu0 }
 0x770   : > { %v2901_v16 = vpop.f32.mrb[10].mxu0 }
 0x771   : > { %v3017_v17 = vcombine.low %v2813_v6, %v2901_v16  ;;  %v3018_v18 = vcombine.high %v2813_v6, %v2901_v16  ;;  %v4323_v20 = vpop.f32.mrb[11].mxu0  ;;  %v2957_v37 = vrot.slane %v2949_v14, %v5791_v40  ;;  %v2964_v56 = vrot.slane %v2950_v13, %v5791_v40 }
 0x772   : > { %v4584_v20 = vld [vmem:[#allocation14 + $0x38] sm:$0xff]  }
 0x773   : > { %v3025_v43 = vrot.slane %v3017_v17, %v5791_v40  ;;  %v3032_v44 = vrot.slane %v3018_v18, %v5791_v40  ;;  %4347 = vmatpush3.bf16.msra.mxu0 %v4584_v20  ;;  %v4596_v20 = vld [vmem:[#allocation15 + $0x34] ss:$8 sps:$4 sm:$0xff]  }
 0x77e   : > { %v2942_v21 = vpop.f32.mrb[20].mxu1 }
 0x77f   : > { %v2965_v24 = vcombine.low %v2854_v9, %v2942_v21  ;;  %v2966_v57 = vcombine.high %v2854_v9, %v2942_v21  ;;  %v4330_v62 = vpop.f32.mrb[21].mxu1 }
 0x780   : > { %v2945_v1 = vpop.f32.mrb[22].mxu1 }
 0x781   : > { %v2973_v27 = vrot.slane %v2965_v24, %v5791_v40  ;;  %v2980_v23 = vrot.slane %v2966_v57, %v5791_v40  ;;  %v3033_v28 = vcombine.low %v2857_v11, %v2945_v1  ;;  %v3034_v30 = vcombine.high %v2857_v11, %v2945_v1  ;;  %v4331_v31 = vpop.f32.mrb[23].mxu1 }
 0x783   : > { %v2981_v32 = vcombine.low %v2957_v37, %v2973_v27  ;;  %v2982_v41 = vcombine.high %v2957_v37, %v2973_v27  ;;  %v2997_v42 = vcombine.low %v2964_v56, %v2980_v23  ;;  %v2998_v36 = vcombine.high %v2964_v56, %v2980_v23 }
 0x784   : > { %v3041_v45 = vrot.slane %v3033_v28, %v5791_v40  ;;  %v3048_v52 = vrot.slane %v3034_v30, %v5791_v40 }
 0x785   : > { %v2989_v38 = vrot.slane %v2981_v32, %v5794_v39  ;;  %v2996_v2 = vrot.slane %v2982_v41, %v5794_v39  ;;  %v3005_v49 = vrot.slane %v2997_v42, %v5794_v39  ;;  %v3012_v50 = vrot.slane %v2998_v36, %v5794_v39 }
 0x786   : > { %v3049_v51 = vcombine.low %v3025_v43, %v3041_v45  ;;  %v3050_v53 = vcombine.high %v3025_v43, %v3041_v45  ;;  %v3065_v54 = vcombine.low %v3032_v44, %v3048_v52  ;;  %v3066_v59 = vcombine.high %v3032_v44, %v3048_v52 }
 0x787   : > { %v3085_v60 = vcombine.low %v2989_v38, %v2996_v2  ;;  %v4056_v61 = vcombine.high %v2989_v38, %v2996_v2  ;;  %v3101_v34 = vcombine.low %v3005_v49, %v3012_v50  ;;  %v4057_v46 = vcombine.high %v3005_v49, %v3012_v50 }
 0x788   : > { %v3057_v63 = vrot.slane %v3049_v51, %v5794_v39  ;;  %v3064_v35 = vrot.slane %v3050_v53, %v5794_v39  ;;  %v3073_v47 = vrot.slane %v3065_v54, %v5794_v39  ;;  %v3080_v55 = vrot.slane %v3066_v59, %v5794_v39 }
 0x789   : > { %v3092_v0 = vrot.slane %v3085_v60, %v5791_v40  ;;  %v3100_v19 = vrot.slane %v4056_v61, %v5791_v40  ;;  %v3108_v58 = vrot.slane %v3101_v34, %v5791_v40  ;;  %v3116_v4 = vrot.slane %v4057_v46, %v5791_v40 }
 0x78a   : > { %v3153_v5 = vcombine.low %v3057_v63, %v3064_v35  ;;  %v4058_v33 = vcombine.high %v3057_v63, %v3064_v35  ;;  %v3169_v22 = vcombine.low %v3073_v47, %v3080_v55  ;;  %v4059_v6 = vcombine.high %v3073_v47, %v3080_v55  ;;  %v4060_v35 = vld [vmem:[%s6195_s21] ss:$0 sm:$0xff] }
 0x78b   : > { %v3118_v7 = vcombine.high %v3092_v0, %v3100_v19  ;;  %v3134_v9 = vcombine.high %v3108_v58, %v3116_v4  ;;  %v3117_v10 = vcombine.low %v3092_v0, %v3100_v19  ;;  %v3133_v11 = vcombine.low %v3108_v58, %v3116_v4 }
 0x78c   : > { %v3160_v25 = vrot.slane %v3153_v5, %v5791_v40  ;;  %v3168_v29 = vrot.slane %v4058_v33, %v5791_v40  ;;  %v3176_v14 = vrot.slane %v3169_v22, %v5791_v40  ;;  %v3184_v13 = vrot.slane %v4059_v6, %v5791_v40  ;;  %v4585_v6 = vld [vmem:[#allocation15] ss:$8 sps:$4 sm:$0xff]  }
 0x78d   : > { %v3132_v15 = vrot.slane %v3118_v7, %v5794_v39  ;;  %v3148_v16 = vrot.slane %v3134_v9, %v5794_v39  ;;  %v3125_v17 = vrot.slane %v3117_v10, %v5794_v39  ;;  %v3141_v18 = vrot.slane %v3133_v11, %v5794_v39  ;;  %v4587_v7 = vld [vmem:[#allocation15 + $0x4] ss:$8 sps:$4 sm:$0xff]  }
 0x78e   : > { %v3186_v21 = vcombine.high %v3160_v25, %v3168_v29  ;;  %v3202_v24 = vcombine.high %v3176_v14, %v3184_v13  ;;  %v3185_v57 = vcombine.low %v3160_v25, %v3168_v29  ;;  %v3201_v62 = vcombine.low %v3176_v14, %v3184_v13  ;;  %3532 = vmatprep.subr.bf16.mxu1 %v4587_v7  ;;  %v4622_v7 = vld [vmem:[#allocation17 + $0x30] sm:$0xff]  }
 0x78f   : > { %v3151_v37 = vcombine.low %v3132_v15, %v3148_v16  ;;  %v3149_v56 = vcombine.low %v3125_v17, %v3141_v18  ;;  %v3150_v1 = vcombine.high %v3125_v17, %v3141_v18  ;;  %v3152_v27 = vcombine.high %v3132_v15, %v3148_v16  ;;  %3533 = vmatpush1.bf16.msra.mxu1 %v4585_v6  ;;  %v4590_v15 = vld [vmem:[#allocation15 + $0x14] ss:$8 sps:$4 sm:$0xff]   ;;  %v4588_v16 = vld [vmem:[#allocation15 + $0x10] ss:$8 sps:$4 sm:$0xff]   ;;  %v4593_v17 = vld [vmem:[#allocation15 + $0x24] ss:$8 sps:$4 sm:$0xff]  }
 0x790   : > { %v3200_v40 = vrot.slane %v3186_v21, %v5794_v39  ;;  %v3216_v23 = vrot.slane %v3202_v24, %v5794_v39  ;;  %v3193_v28 = vrot.slane %v3185_v57, %v5794_v39  ;;  %v3209_v30 = vrot.slane %v3201_v62, %v5794_v39  ;;  %3534 = vmatprep.subr.bf16.mxu1 %v4590_v15  ;;  %v4591_v18 = vld [vmem:[#allocation15 + $0x20] ss:$8 sps:$4 sm:$0xff]   ;;  %v4594_v21 = vld [vmem:[#allocation15 + $0x30] ss:$8 sps:$4 sm:$0xff]   ;;  %v4599_v24 = vld [vmem:[#allocation15 + $0x44] ss:$8 sps:$4 sm:$0xff]  }
 0x791   : > { %v2054_v47 = vunpack.c.l.bf16 %v5768_v8  ;;  %v2055_v58 = vunpack.c.h.bf16 %v5768_v8  ;;  %v4597_v57 = vld [vmem:[#allocation15 + $0x40] ss:$8 sps:$4 sm:$0xff]   ;;  %v4602_v62 = vld [vmem:[#allocation15 + $0x54] ss:$8 sps:$4 sm:$0xff]  }
 0x792   : > { %v3219_v31 = vcombine.low %v3200_v40, %v3216_v23  ;;  %v3218_v32 = vcombine.high %v3193_v28, %v3209_v30  ;;  %v3217_v41 = vcombine.low %v3193_v28, %v3209_v30  ;;  %v3220_v42 = vcombine.high %v3200_v40, %v3216_v23  ;;  %v4606_v40 = vld [vmem:[#allocation15 + $0x70] ss:$8 sps:$4 sm:$0xff]   ;;  %v4609_v23 = vld [vmem:[#allocation17 + $0x40] sm:$0xff]   ;;  %v4611_v30 = vld [vmem:[#allocation17 + $0x48] sm:$0xff]  }
 0x793   : > { %3535 = vmatpush1.bf16.msra.mxu1 %v4588_v16  ;;  %v4610_v28 = vld [vmem:[#allocation17] sm:$0xff]   ;;  %4186 = vmatprep.subr.bf16.mxu0 %v4609_v23  ;;  %v4621_v6 = vld [vmem:[#allocation17 + $0x70] sm:$0xff]  }
 0x794   : > { %v4558_v36 = vpack.i.bf16 %v3219_v31, %v3151_v37  ;;  %v4553_v43 = vpack.i.bf16 %v3218_v32, %v3150_v1  ;;  %v4563_v44 = vpack.i.bf16 %v3220_v42, %v3152_v27  ;;  %3536 = vmatprep.subr.bf16.mxu1 %v4593_v17  ;;  %v4600_v37 = vld [vmem:[#allocation15 + $0x50] ss:$8 sps:$4 sm:$0xff]   ;;  %v4605_v1 = vld [vmem:[#allocation15 + $0x64] ss:$8 sps:$4 sm:$0xff]   ;;  %v4608_v27 = vld [vmem:[#allocation15 + $0x74] ss:$8 sps:$4 sm:$0xff]  }
 0x795   : > { %v4612_v31 = vld [vmem:[#allocation17 + $0x8] sm:$0xff]   ;;  %v4613_v32 = vld [vmem:[#allocation17 + $0x50] sm:$0xff]   ;;  %v4615_v42 = vld [vmem:[#allocation17 + $0x58] sm:$0xff]  }
 0x796   : > { %4559 = vrot.lane.b32.xlu1 %v4558_v36, %s6139_s9  ;;  %4554 = vrot.lane.b32.xlu0 %v4553_v43, %s5032_s19  ;;  %v4616_v36 = vld [vmem:[#allocation17 + $0x18] sm:$0xff]   ;;  %v4617_v43 = vld [vmem:[#allocation17 + $0x60] sm:$0xff]   ;;  %s6203_s19 = sld [smem:[#allocation46_spill]] }
 0x797   : > { %3537 = vmatpush1.bf16.msra.mxu1 %v4591_v18 }
 0x798   : > { %3538 = vmatprep.subr.bf16.mxu1 %v4596_v20 }
 0x79a   : > { %4564 = vrot.lane.b32.xlu1 %v4563_v44, %s5033_s20  ;;  %v4618_v44 = vld [vmem:[#allocation17 + $0x20] sm:$0xff]   ;;  %s6197_s20 = sld [smem:[#allocation41_spill]] }
 0x79b   : > { %3539 = vmatpush1.bf16.msra.mxu1 %v4594_v21 }
 0x79c   : > { %3540 = vmatprep.subr.bf16.mxu1 %v4599_v24 }
 0x79f   : > { %3541 = vmatpush1.bf16.msra.mxu1 %v4597_v57 }
 0x7a0   : > { %3542 = vmatprep.subr.bf16.mxu1 %v4602_v62 }
 0x7a3   : > { %3543 = vmatpush1.bf16.msra.mxu1 %v4600_v37 }
 0x7a4   : > { %3544 = vmatprep.subr.bf16.mxu1 %v4605_v1 }
 0x808   : > { %v4560_v45 = vpop.permute.xlu1 %4559  ;;  %v4555_v52 = vpop.permute.xlu0 %4554 }
 0x809   : > { %v4557_v38 = vunpack.i.h.bf16 %v4555_v52  ;;  %v4556_v2 = vunpack.i.l.bf16 %v4555_v52  ;;  %v4562_v49 = vunpack.i.h.bf16 %v4560_v45  ;;  %v4561_v50 = vunpack.i.l.bf16 %v4560_v45  ;;  %v4619_v45 = vld [vmem:[#allocation17 + $0x68] sm:$0xff]  }
 0x80b   : > { %v3245_v39 = vsel %vm2458_vm2, %v3149_v56, %v4556_v2  ;;  %v3246_v51 = vsel %vm2458_vm2, %v3217_v41, %v4557_v38  ;;  %v4603_v56 = vld [vmem:[#allocation15 + $0x60] ss:$8 sps:$4 sm:$0xff]   ;;  %v4614_v41 = vld [vmem:[#allocation17 + $0x10] sm:$0xff]  }
 0x80c   : > { %v4565_v53 = vpop.permute.xlu1 %4564  ;;  %v3248_v60 = vsel %vm3247_vm4, %v3245_v39, %v4561_v50  ;;  %v3249_v61 = vsel %vm3247_vm4, %v3246_v51, %v4562_v49  ;;  %3545 = vmatpush1.bf16.msra.mxu1 %v4603_v56  ;;  %v3368_v51 = vadd.s32 8, %v5786_v26 }
 0x80d   : > { %v4567_v54 = vunpack.i.h.bf16 %v4565_v53  ;;  %v4566_v59 = vunpack.i.l.bf16 %v4565_v53  ;;  %3546 = vmatprep.subr.bf16.mxu1 %v4608_v27  ;;  %v3369_v53 = vstv %s4032_s1  ;;  %s4111_s1 = sshll.u32 %s6191_s13, 1 }
 0x80f   : > { %v3251_v34 = vsel %vm3250_vm5, %v3248_v60, %v4566_v59  ;;  %v3252_v46 = vsel %vm3250_vm5, %v3249_v61, %v4567_v54  ;;  %v4071_v59 = vld [vmem:[%s6196_s17] ss:$0 sm:$0xff]  ;;  %v3370_v60 = vadd.s32 %v3369_v53, %v5786_v26  ;;  %v3371_v61 = vadd.s32 %v3369_v53, %v3368_v51  ;;  %s6200_s17 = sld [smem:[#allocation27_spill]] }
 0x810   : > { %v3253_v63 = vpack.c.bf16 %v3252_v46, %v3251_v34  ;;  %3547 = vmatpush1.bf16.msra.mxu1 %v4606_v40 }
 0x811   : > { %vm3372_vm6 = vcmp.lt.s32.totalorder %v3370_v60, %v5850_v48  ;;  %vm3373_vm7 = vcmp.lt.s32.totalorder %v3371_v61, %v5850_v48  ;;  %v4623_v48 = vld [vmem:[#allocation17 + $0x78] sm:$0xff]  }
 0x812   : > { %4349 = vmatmul.mubr.bf16.vlgmr.msra.gmra.mrb[12].mxu0 %v3253_v63 }
 0x813   : > { %4187 = vmatpush3.bf16.msra.mxu0 %v4610_v28 }
 0x814   : > { %4188 = vmatprep.subr.bf16.mxu0 %v4611_v30 }
 0x815   : > { %s4112_s3 = sshll.u32 %s6200_s17, 2 }
 0x817   : > { %4189 = vmatpush3.bf16.msra.mxu0 %v4612_v31 }
 0x818   : > { %4190 = vmatprep.subr.bf16.mxu0 %v4613_v32 }
 0x81b   : > { %4191 = vmatpush3.bf16.msra.mxu0 %v4614_v41 }
 0x81c   : > { %4192 = vmatprep.subr.bf16.mxu0 %v4615_v42 }
 0x81f   : > { %4193 = vmatpush3.bf16.msra.mxu0 %v4616_v36 }
 0x820   : > { %4194 = vmatprep.subr.bf16.mxu0 %v4617_v43 }
 0x823   : > { %4195 = vmatpush3.bf16.msra.mxu0 %v4618_v44 }
 0x824   : > { %4196 = vmatprep.subr.bf16.mxu0 %v4619_v45 }
 0x8e5   : > { %v3359_v55 = vpop.f32.mrb[12].mxu0 }
 0x8e6   : > { %v3360_v0 = vadd.f32 %v4060_v35, %v3359_v55  ;;  %v4350_v19 = vpop.f32.mrb[13].mxu0 }
 0x8e7   : > { %v3362_v4 = vpop.f32.mrb[14].mxu0  ;;  %v6003_v19 = vsel %vm3372_vm6, 1.0, %v5030_v3 }
 0x8e8   : > { %v3363_v12 = vadd.f32 %v4060_v35, %v3362_v4  ;;  %v4351_v5 = vpop.f32.mrb[15].mxu0  ;;  %v3378_v33 = vadd.f32 %v3360_v0, %v2054_v47  ;;  %v4072_v35 = vld [vmem:[%s6197_s20] ss:$0 sm:$0xff]  ;;  %s6201_s20 = sld [smem:[#allocation44_spill]] }
 0x8ea   : > { %3382 = vadd.xlane.f32.xlu0 %v3378_v33  ;;  %v3379_v22 = vadd.f32 %v3363_v12, %v2055_v58  ;;  %v6006_v58 = vsel %vm3373_vm7, 1.0, %v5030_v3  ;;  %v3444_v3 = vsub.s32 0, %v5786_v26 }
 0x8ec   : > { %3384 = vadd.xlane.f32.xlu1 %v3379_v22 }
 0x8ee   : > { %v4106_v61 = vld [vmem:[%s6201_s20] ss:$0 sm:$0xff] }
 0x977   : > { %v3383_v9 = vpop.xlane.xlu0 %3382 }
 0x978   : > { %v3387_v10 = vmul.f32 0.0078125, %v3383_v9  ;;  %v4624_v9 = vld [vmem:[#allocation17 + $0x38] sm:$0xff]  }
 0x979   : > { %v3385_v11 = vpop.xlane.xlu1 %3384 }
 0x97a   : > { %v5980_v25 = vsub.f32 %v3378_v33, %v3387_v10  ;;  %v3388_v29 = vmul.f32 0.0078125, %v3385_v11  ;;  %v3440_v10 = vld [vmem:[%s6198_s24] sm:$0x3]  ;;  %v3448_v11 = vsub.s32 1, %v5786_v26  ;;  %s5038_s24 = smov [#allocation18]  }
 0x97b   : > { %v4089_v26 = vld [vmem:[%s6199_s8] ss:$0 sm:$0xff]  ;;  %s3824_s8 = sadd.s32 %s4112_s3, %s4111_s1  ;;  %s6041_s1 = scalar_lea.sflag [#allocation8], %s670_s7 }
 0x97c   : > { %v5982_v14 = vsub.f32 %v3379_v22, %v3388_v29  ;;  %v3391_v8 = vmul.f32 %v5980_v25, %v5980_v25  ;;  %v4620_v22 = vld [vmem:[#allocation17 + $0x28] sm:$0xff]   ;;  %v3449_v29 = vrot.slane %v3440_v10, %v3448_v11  ;;  %s4113_s9 = sshll.u32 %s3824_s8, 6  ;;  %s4874_s3 = scalar_lea.vmem %s6035_s6, 128 }
 0x97d   : > { %4197 = vmatpush3.bf16.msra.mxu0 %v4620_v22  ;;  %s6033_s20 = scalar_lea.hbm %s6203_s19, %s4113_s9  ;;  %p4875_p2 = scmp.ne.s32.totalorder %s6035_s6, %s4874_s3 }
 0x97e   : > { %3393 = vadd.xlane.f32.xlu0 %v3391_v8  ;;  %v3392_v13 = vmul.f32 %v5982_v14, %v5982_v14  ;;  %4198 = vmatprep.subr.bf16.mxu0 %v4621_v6  ;;  %s4878_s21 = sshll.u32 %s5038_s24, 4  ;;  %s4879_s21 = int_to_ptr.vmem [resolvable:$false] %s4878_s21 }
 0x97f   : > { %p4876_p12 = pnand %p4875_p2, %p6204_p9  ;;  %s4880_s9 = scalar_lea.vmem %s4879_s21, 256 }
 0x980   : > { %p4881_p1 = scmp.lt.s32.totalorder %s6035_s6, %s4879_s21  ;;  %p4882_p4 = scmp.lt.s32.totalorder %s4880_s9, %s4874_s3 }
 0x981   : > { %4199 = vmatpush3.bf16.msra.mxu0 %v4622_v7  ;;  %p4877_p0 = pneg %p4876_p12 }
 0x982   : > { %3395 = vadd.xlane.f32.xlu0 %v3392_v13  ;;  %4200 = vmatprep.subr.bf16.mxu0 %v4623_v48  ;;  %p4883_p3 = por %p4882_p4, %p4881_p1 }
 0x984   : > { %p4884_p10 = pnand %p4883_p3, %p4877_p0 }
 0x985   : > { %4201 = vmatpush3.bf16.msra.mxu0 %v4624_v9 }
 0xa0b   : > { %v3394_v52 = vpop.xlane.xlu0 %3393 }
 0xa0c   : > { %v3397_v38 = vmul.f32 0.0078125, %v3394_v52 }
 0xa0e   : > { %v3399_v2 = vadd.f32 1e-05, %v3397_v38 }
 0xa0f   : > { %v3396_v49 = vpop.xlane.xlu0 %3395 }
 0xa10   : > { %4658 = vrsqrt.f32 %v3399_v2  ;;  %v3398_v50 = vmul.f32 0.0078125, %v3396_v49 }
 0xa12   : > { %v3400_v39 = vadd.f32 1e-05, %v3398_v50 }
 0xa14   : > { %4660 = vrsqrt.f32 %v3400_v39 }
 0xa1a   : > { %v4659_v54 = vpop.eup %4658 }
 0xa1b   : > { %v3403_v34 = vmul.f32 %v4659_v54, %v5980_v25  ;;  %v3445_v25 = vrot.slane %v3440_v10, %v3444_v3 }
 0xa1d   : > { %v3411_v46 = vmul.f32 %v4071_v59, %v3403_v34 }
 0xa1e   : > { %v4661_v63 = vpop.eup %4660 }
 0xa1f   : > { %v3404_v47 = vmul.f32 %v4661_v63, %v5982_v14  ;;  %v3419_v0 = vadd.f32 %v4072_v35, %v3411_v46  ;;  %v4107_v63 = vld [vmem:[%s6202_s16] ss:$0 sm:$0xff] }
 0xa21   : > { %v3412_v55 = vmul.f32 %v4071_v59, %v3404_v47  ;;  %v3421_v12 = vmul.f32 %v6003_v19, %v3419_v0 }
 0xa23   : > { %v3420_v4 = vadd.f32 %v4072_v35, %v3412_v55 }
 0xa25   : > { %v3422_v5 = vmul.f32 %v6006_v58, %v3420_v4 }
 0xa27   : > { %v3423_v33 = vpack.c.bf16 %v3422_v5, %v3421_v12 }
 0xa29   : > { %3565 = vmatmul.mubr.bf16.vlgmr.msra.gmra.mrb[24].mxu1 %v3423_v33 }
 0xafc   : > { %v3566_v14 = vpop.f32.mrb[24].mxu1 }
 0xafd   : > { %v3567_v8 = vadd.f32 %v3566_v14, %v3445_v25  ;;  %v3568_v13 = vpop.f32.mrb[25].mxu1 }
 0xafe   : > { %v3569_v15 = vadd.f32 %v3568_v13, %v3449_v29  ;;  %v3570_v16 = vpop.f32.mrb[26].mxu1 }
 0xaff   : > { %v3571_v17 = vadd.f32 %v3570_v16, %v3445_v25  ;;  %v3572_v18 = vpop.f32.mrb[27].mxu1  ;;  %v3575_v21 = vmax.f32 %v3567_v8, 0.0 }
 0xb00   : > { %v3573_v20 = vadd.f32 %v3572_v18, %v3449_v29  ;;  %v3576_v57 = vmax.f32 %v3569_v15, 0.0 }
 0xb01   : > { %v3577_v24 = vmax.f32 %v3571_v17, 0.0 }
 0xb02   : > { %v3578_v62 = vmax.f32 %v3573_v20, 0.0 }
 0xb03   : > { %v3579_v37 = vpack.c.bf16 %v3577_v24, %v3575_v21 }
 0xb04   : > { %v3580_v56 = vpack.c.bf16 %v3578_v62, %v3576_v57 }
 0xb06   : > { %3748 = vmatprep.mubr.bf16.mxu0 %v3580_v56 }
 0xb07   : > { %3749 = vmatmul.mubr.bf16.vlgmr.msra.gmra.mrb[16].mxu0 %v3579_v37 }
 0xbda   : > { %v4202_v1 = vpop.f32.mrb[16].mxu0 }
 0xbdb   : > { %v4203_v27 = vpop.f32.mrb[17].mxu0 }
 0xbdc   : > { %v4204_v40 = vadd.f32 %v4203_v27, %v4202_v1  ;;  %v4205_v23 = vpop.f32.mrb[18].mxu0 }
 0xbdd   : > { %v4206_v28 = vpop.f32.mrb[19].mxu0 }
 0xbde   : > { %v3751_v30 = vadd.f32 %v4204_v40, %v4089_v26  ;;  %v4207_v31 = vadd.f32 %v4206_v28, %v4205_v23 }
 0xbe0   : > { %v3754_v32 = vadd.f32 %v4207_v31, %v4089_v26  ;;  %v3757_v41 = vadd.f32 %v3751_v30, %v3421_v12 }
 0xbe2   : > { %3761 = vadd.xlane.f32.xlu1 %v3757_v41  ;;  %v3758_v42 = vadd.f32 %v3754_v32, %v3422_v5 }
 0xbe4   : > { %3763 = vadd.xlane.f32.xlu0 %v3758_v42 }
 0xc6f   : > { %v3762_v36 = vpop.xlane.xlu1 %3761 }
 0xc70   : > { %v3765_v43 = vmul.f32 0.0078125, %v3762_v36 }
 0xc71   : > { %v3764_v44 = vpop.xlane.xlu0 %3763 }
 0xc72   : > { %v3767_v45 = vsub.f32 %v3757_v41, %v3765_v43  ;;  %v3766_v52 = vmul.f32 0.0078125, %v3764_v44 }
 0xc74   : > { %v3768_v38 = vsub.f32 %v3758_v42, %v3766_v52  ;;  %v3769_v2 = vmul.f32 %v3767_v45, %v3767_v45 }
 0xc76   : > { %3771 = vadd.xlane.f32.xlu1 %v3769_v2  ;;  %v3770_v49 = vmul.f32 %v3768_v38, %v3768_v38 }
 0xc78   : > { %3773 = vadd.xlane.f32.xlu0 %v3770_v49 }
 0xd03   : > { %v3772_v50 = vpop.xlane.xlu1 %3771 }
 0xd04   : > { %v3775_v39 = vmul.f32 0.0078125, %v3772_v50 }
 0xd05   : > { %v3774_v51 = vpop.xlane.xlu0 %3773 }
 0xd06   : > { %v3777_v53 = vadd.f32 1e-05, %v3775_v39  ;;  %v3776_v54 = vmul.f32 0.0078125, %v3774_v51 }
 0xd08   : > { %4662 = vrsqrt.f32 %v3777_v53  ;;  %v3778_v59 = vadd.f32 1e-05, %v3776_v54 }
 0xd0a   : > { %4664 = vrsqrt.f32 %v3778_v59 }
 0xd12   : > { %v4663_v60 = vpop.eup %4662 }
 0xd13   : > { %v3781_v34 = vmul.f32 %v4663_v60, %v3767_v45 }
 0xd14   : > { %v4665_v46 = vpop.eup %4664 }
 0xd15   : > { %v3789_v35 = vmul.f32 %v4106_v61, %v3781_v34  ;;  %v3782_v47 = vmul.f32 %v4665_v46, %v3768_v38 }
 0xd17   : > { %v3790_v55 = vmul.f32 %v4106_v61, %v3782_v47  ;;  %v3797_v0 = vadd.f32 %v4107_v63, %v3789_v35 }
 0xd19   : > { %v3798_v4 = vadd.f32 %v4107_v63, %v3790_v55  ;;  %v3799_v12 = vmul.f32 %v6003_v19, %v3797_v0 }
 0xd1b   : > { %v3800_v5 = vmul.f32 %v6006_v58, %v3798_v4 }
 0xd1d   : > { %v4122_v33 = vpack.c.bf16 %v3800_v5, %v3799_v12 }
 0xd1f   : > { %4123 = vst [vmem:[%s672_s5] sm:$0xff] %v4122_v33  }
 0xd20   : > { %4887 = shalt.err (!%p4884_p10)
}
 0xd21   : > { %s4888_s7 = scalar_lea.hbm %s6033_s20, 128  ;;  %s4892_s16 = scalar_lea.hbm %s6203_s19, 512 }
 0xd22   : > { %p4889_p5 = scmp.ne.s32.totalorder %s6033_s20, %s4888_s7  ;;  %p4893_p6 = scmp.lt.u32.totalorder %s6033_s20, %s6203_s19 }
 0xd23   : > { %p4894_p11 = scmp.lt.u32.totalorder %s4892_s16, %s4888_s7  ;;  %p4896_p2 = scmp.lt.u32.totalorder %s4888_s7, %s6033_s20 }
 0xd24   : > { %p4890_p7 = pnand %p4889_p5, %p6204_p9 }
 0xd25   : > { %p4895_p8 = por %p4894_p11, %p4893_p6 }
 0xd26   : > { %p4891_p13 = pneg %p4890_p7 }
 0xd27   : > { %p4897_p12 = por %p4896_p2, %p4895_p8 }
 0xd29   : > { %p4898_p0 = pnand %p4897_p12, %p4891_p13 }
 0xd2b   : > { %4901 = shalt.err (!%p4898_p0)
}
 0xd2c   : > { %s5039_s17 = smov 4   ;;  %s6205_s3 = smov 64  }
 0xd2d   : > { %4378 = dma.vmem_to_hbm [thread:$0]  (%p6204_p9), %s6035_s6, 128, %s6033_s20, %s6041_s1, %s6205_s3, %s6205_s3, %s5039_s17  }
 0xd2e PF: > { %s6206_s24 = sld [smem:[#allocation25_spill]]  ;;  %p4420_p1 = scmp.ge.s32.totalorder %s5010_s0, 2 }
 0xd2f   : > { %p6207_p4 = scmp.ne.s32.totalorder %s6181_s4, 0 }
 0xd31   : > { %p4404_p3 = pnand %p4420_p1, %p6207_p4 }
 0xd34   : > { %s3842_s21 = sand.u32 1, %s6206_s24  }
 0xd35   : > { %s3843_s9 = scalar_lea.sflag [#allocation8], %s3842_s21 }
 0xd36   : > { %4965 = dma.done.wait (!%p4404_p3), %s3843_s9, 128  }
 0xd37   : > { %4967 = vsyncadd (!%p4404_p3), %s3843_s9, 4294967168  ;;  %s41_s0 = sadd.s32 1, %s5010_s0   ;;  %s6208_s15 = smov %s5425_s2 }
 0xd38   : > { %p38_p10 = scmp.ge.s32.totalorder %s41_s0, 6   ;;  %s6209_s6 = smov %s6221_s27 }
 0xd39   : > { %s6210_s2 = smov %s4974_s11  ;;  %s6211_s11 = smov %s4978_s23 }
 0xd3a   : > { %s6212_s23 = smov %s6208_s15  ;;  %s6213_s24 = smov %s4986_s25 }
 0xd3b   : > { %s6214_s25 = smov %s4990_s26  ;;  %s6215_s26 = smov %s5422_s18 }
 0xd3c   : > { %s6216_s27 = smov %s5002_s29  ;;  %s6217_s28 = smov %s5006_s30 }
 0xd3d   : > { %s6218_s29 = smov %s6209_s6  ;;  %s6219_s30 = smov %s6225_s22 }
 0xd3e   :  { %40 = sbr.rel (!%p38_p10) target bundleno = 36 (0x24), region = 162 }
 0xd45   :  { %3848 = vsyncpa [#allocation7], 1 }
 0xd46   :  { %3850 = vsyncpa [#allocation7 + $0x1], 1 }
 0xd47   :  { %3851 = vsyncpa [#allocation10], 1 }
 0xd48   :  { %3852 = vsyncpa [#allocation13], 1 }
 0xd49   :  { %3853 = vsyncpa [#allocation16], 1 }
 0xd4a   :  { %3854 = vsyncpa [#allocation8], 1 }
 0xd4b   :  { %3856 = vsyncpa [#allocation8 + $0x1], 1 }

</bundles_post_ra>
